<compile_context>
chip_gen: v7x
topology: tpu7x:2x2x1
jax: 0.10.0
libtpu: 0.0.40
codegen_flags: <defaults>
</compile_context>

<pallas_src>
import math

import jax
import jax.numpy as jnp
from jax.experimental import pallas as pl
from jax.experimental.pallas import tpu as pltpu


# ----------------------------- Pallas kernel --------------------------------
def _lstm_recurrence_kernel(gx_ref, whh_ref, h0_ref, c0_ref,
                            out_ref, hn_ref, cn_ref, h_sc, c_sc):
    """Sequential h/c recurrence over one time chunk of one direction.

    Grid = (direction, batch_tile, time_chunk), time_chunk innermost.
      gx_ref  : (TS, TB, 4H) precomputed x @ W_ih^T + (b_ih + b_hh), gate order [i,f,o,g]
      whh_ref : (H, 4H)      transposed hidden weights, same gate order
      h0/c0   : (TB, H)      initial hidden / cell state
      out_ref : (TS, TB, H)  per-step hidden states for this chunk
      hn/cn   : (TB, H)      final state (last write-back per (d, b) block wins)
      h_sc/c_sc: (TB, H)     VMEM carry across time chunks
    """
    TS = gx_ref.shape[0]
    H = h0_ref.shape[-1]
    chunk = pl.program_id(2)

    @pl.when(chunk == 0)
    def _init_carry():
        h_sc[...] = h0_ref[...]
        c_sc[...] = c0_ref[...]

    whh = whh_ref[...]          # hoisted: one VMEM load per chunk, not per step
    # TODO(synk): hold W_hh weight-stationary on the MXU across the time loop
    # (pltpu.matmul_push_rhs / matmul_acc_lhs / matmul_pop) once the batch tile
    # is large enough for the per-step weight push to dominate; jnp.dot keeps
    # this portable across v5e/v6e/v7x result-path differences (MRF vs MRB).

    def cell(h, c, t):
        gates = gx_ref[t] + jnp.dot(h, whh, preferred_element_type=jnp.float32)
        ifo = jax.nn.sigmoid(gates[:, :3 * H])      # [i | f | o] in one EUP pass
        g = jnp.tanh(gates[:, 3 * H:])
        c_new = ifo[:, H:2 * H] * c + ifo[:, :H] * g
        h_new = ifo[:, 2 * H:] * jnp.tanh(c_new)
        out_ref[t] = h_new                          # constant-offset store
        return h_new, c_new

    @pl.when(pl.program_id(0) == 0)                 # forward direction
    def _fwd():
        h, c = h_sc[...], c_sc[...]
        for t in range(TS):                         # static indices
            h, c = cell(h, c, t)
        h_sc[...] = h
        c_sc[...] = c

    @pl.when(pl.program_id(0) == 1)                 # backward direction
    def _bwd():
        h, c = h_sc[...], c_sc[...]
        for t in range(TS - 1, -1, -1):             # static reversed indices
            h, c = cell(h, c, t)
        h_sc[...] = h
        c_sc[...] = c

    # hn/cn block index is constant across the chunk axis -> only the write-back
    # after the last chunk of each (direction, batch_tile) reaches HBM.
    hn_ref[...] = h_sc[...]
    cn_ref[...] = c_sc[...]


# ------------------------------ tiling helpers -------------------------------
def _largest_divisor_leq(n, cap):
    for t in range(min(n, cap), 0, -1):
        if n % t == 0:
            return t
    return n


def _pick_batch_tile(b, cap=256):
    if b <= cap:
        return b
    for t in range(cap, 7, -8):                     # multiples of 8 (sublane rule)
        if b % t == 0:
            return t
    return b


def _pick_time_chunk(s, cap=32):
    # TODO(synk): ragged S (no small divisor) falls back to tiny chunks; pad S
    # and mask if that ever matters for production shapes.
    return _largest_divisor_leq(s, cap)


# ------------------------------ layer wrapper --------------------------------
def lstm_layer(x_tm, wih_t, whh_t, bias, h0, c0):
    """One (possibly bidirectional) LSTM layer over the whole sequence.

    x_tm  : (S, B, F) time-major layer input
    wih_t : (D, F, 4H), whh_t : (D, H, 4H), bias : (D, 4H)  (gate order [i,f,o,g])
    h0/c0 : (D, B, H)
    returns (out (D, S, B, H), h_n (D, B, H), c_n (D, B, H))
    """
    S, B, F = x_tm.shape
    D, H, G4 = whh_t.shape

    # Hoisted input projection: one batched MXU-friendly matmul over all
    # timesteps and both directions (XLA); only the recurrence stays in Pallas.
    # TODO(synk): bf16 operands (gx, h, W_hh) with f32 accumulation for v6e/v7x
    # throughput + VMEM/HBM savings; kept f32 to preserve exact f32 numerics.
    gx = (jnp.einsum('sbf,dfg->dsbg', x_tm, wih_t,
                     preferred_element_type=jnp.float32)
          + bias[:, None, None, :])                        # (D, S, B, 4H)

    TB = _pick_batch_tile(B)
    TS = _pick_time_chunk(S)
    NB = B // TB
    NSC = S // TS

    def chunk_idx(d, s):
        # forward (d==0) walks chunks 0..NSC-1; backward walks them reversed
        return jnp.where(d == 0, s, NSC - 1 - s)

    grid_spec = pltpu.PrefetchScalarGridSpec(
        num_scalar_prefetch=0,
        grid=(D, NB, NSC),
        in_specs=[
            pl.BlockSpec((None, TS, TB, G4),
                         lambda d, b, s: (d, chunk_idx(d, s), b, 0)),   # G_x
            pl.BlockSpec((None, H, G4), lambda d, b, s: (d, 0, 0)),     # W_hh^T
            pl.BlockSpec((None, TB, H), lambda d, b, s: (d, b, 0)),     # h0
            pl.BlockSpec((None, TB, H), lambda d, b, s: (d, b, 0)),     # c0
        ],
        out_specs=[
            pl.BlockSpec((None, TS, TB, H),
                         lambda d, b, s: (d, chunk_idx(d, s), b, 0)),   # outputs
            pl.BlockSpec((None, TB, H), lambda d, b, s: (d, b, 0)),     # h_n
            pl.BlockSpec((None, TB, H), lambda d, b, s: (d, b, 0)),     # c_n
        ],
        scratch_shapes=[
            pltpu.VMEM((TB, H), jnp.float32),   # h carry across chunks
            pltpu.VMEM((TB, H), jnp.float32),   # c carry across chunks
        ],
    )
    out_shapes = (
        jax.ShapeDtypeStruct((D, S, B, H), jnp.float32),
        jax.ShapeDtypeStruct((D, B, H), jnp.float32),
        jax.ShapeDtypeStruct((D, B, H), jnp.float32),
    )

    # VMEM budget: double-buffered gx/out chunks + weights + states, 2x headroom.
    f32 = 4
    needed = (2 * (TS * TB * G4 + TS * TB * H) + 2 * H * G4 + 8 * TB * H) * f32
    vmem_limit = int(min(max(2 * needed, 32 * 1024 * 1024), 64 * 1024 * 1024))

    return pl.pallas_call(
        _lstm_recurrence_kernel,
        out_shape=out_shapes,
        grid_spec=grid_spec,
        compiler_params=pltpu.CompilerParams(
            # directions / batch tiles are independent -> "parallel" (second TC
            # on v7x); time chunks carry h/c -> "arbitrary".
            dimension_semantics=("parallel", "parallel", "arbitrary"),
            vmem_limit_bytes=vmem_limit),
    )(gx, whh_t, h0, c0)


# --------------------------- Module-level wrapper ----------------------------
class PointerEncoderPallas:
    """JAX/Pallas re-implementation of PointerEncoder (nn.LSTM forward)."""

    def __init__(self, embedding_dim, hidden_dim, n_layers, dropout, bidir, key):
        self.embedding_dim = embedding_dim
        self.hidden_dim = hidden_dim // 2 if bidir else hidden_dim  # per-dir H
        self.n_layers = n_layers
        self.num_dirs = 2 if bidir else 1
        self.n_state = n_layers * self.num_dirs   # == PyTorch self.n_layers
        self.bidir = bidir
        # TODO(synk): inter-layer dropout not applied (dropout=0 / eval mode).
        self.dropout = dropout

        H = self.hidden_dim
        D = self.num_dirs
        bound = 1.0 / math.sqrt(H)
        # Gate order stored as [i, f, o, g] (kernel-friendly). NOTE: PyTorch's
        # native nn.LSTM row order is [i, f, g, o]; a weight loader must permute
        # the (g, o) row blocks when importing torch checkpoints.
        # per layer: (wih_t (D, F, 4H), whh_t (D, H, 4H), bias (D, 4H))
        self.params = []
        for layer in range(n_layers):
            in_dim = embedding_dim if layer == 0 else H * D
            wihs, whhs, bs = [], [], []
            for _ in range(D):
                key, k1, k2, k3, k4 = jax.random.split(key, 5)
                wih = jax.random.uniform(k1, (4 * H, in_dim), jnp.float32, -bound, bound)
                whh = jax.random.uniform(k2, (4 * H, H), jnp.float32, -bound, bound)
                bih = jax.random.uniform(k3, (4 * H,), jnp.float32, -bound, bound)
                bhh = jax.random.uniform(k4, (4 * H,), jnp.float32, -bound, bound)
                wihs.append(wih.T)          # store transposed for x @ W^T
                whhs.append(whh.T)
                bs.append(bih + bhh)        # fused bias
            self.params.append((jnp.stack(wihs), jnp.stack(whhs), jnp.stack(bs)))

    def init_hidden(self, embedded_inputs):
        B = embedded_inputs.shape[0]
        h0 = jnp.zeros((self.n_state, B, self.hidden_dim), jnp.float32)
        c0 = jnp.zeros((self.n_state, B, self.hidden_dim), jnp.float32)
        return (h0, c0)

    def forward(self, embedded_inputs, hidden):
        """embedded_inputs: (B, S, E); hidden: (h0, c0) each (n_state, B, H)."""
        h0_all, c0_all = hidden
        D = self.num_dirs
        # time-major once at entry; back to batch-major once at exit
        x_tm = jnp.transpose(embedded_inputs, (1, 0, 2)).astype(jnp.float32)
        hns, cns = [], []
        for layer in range(self.n_layers):
            wih_t, whh_t, bias = self.params[layer]
            h0 = h0_all[layer * D:(layer + 1) * D]
            c0 = c0_all[layer * D:(layer + 1) * D]
            out, hn, cn = lstm_layer(x_tm, wih_t, whh_t, bias, h0, c0)
            hns.append(hn)
            cns.append(cn)
            S, B = out.shape[1], out.shape[2]
            # next layer input: (S, B, D*H), features ordered [forward | backward]
            # TODO(synk): for H >= 128, write both directions straight into one
            # lane-dense (S, B, D*H) output block (out_spec index_map (0,b,d))
            # and drop this copy; at H=16 the block would violate the 128-lane rule.
            x_tm = jnp.moveaxis(out, 0, 2).reshape(S, B, D * self.hidden_dim)
        outputs = jnp.transpose(x_tm, (1, 0, 2))            # (B, S, D*H)
        h_n = jnp.concatenate(hns, axis=0)                  # (n_layers*D, B, H)
        c_n = jnp.concatenate(cns, axis=0)
        return outputs, (h_n, c_n)


# ------------------------------ pure-JAX reference ---------------------------
def _lstm_ref_direction(x_tm, wih_t, whh_t, bias, h0, c0, reverse):
    H = whh_t.shape[0]
    xs = x_tm[::-1] if reverse else x_tm

    def step(carry, x_t):
        h, c = carry
        gates = x_t @ wih_t + h @ whh_t + bias            # gate order [i,f,o,g]
        i_g = jax.nn.sigmoid(gates[:, 0:H])
        f_g = jax.nn.sigmoid(gates[:, H:2 * H])
        o_g = jax.nn.sigmoid(gates[:, 2 * H:3 * H])
        g_g = jnp.tanh(gates[:, 3 * H:4 * H])
        c_new = f_g * c + i_g * g_g
        h_new = o_g * jnp.tanh(c_new)
        return (h_new, c_new), h_new

    (hn, cn), outs = jax.lax.scan(step, (h0, c0), xs)
    if reverse:
        outs = outs[::-1]
    return outs, hn, cn


def _forward_ref(encoder, x, hidden):
    h0_all, c0_all = hidden
    D = encoder.num_dirs
    x_tm = jnp.transpose(x, (1, 0, 2))
    hns, cns = [], []
    for layer in range(encoder.n_layers):
        wih_t, whh_t, bias = encoder.params[layer]
        dir_outs = []
        for d in range(D):
            idx = layer * D + d
            outs, hn, cn = _lstm_ref_direction(
                x_tm, wih_t[d], whh_t[d], bias[d],
                h0_all[idx], c0_all[idx], reverse=(d == 1))
            dir_outs.append(outs)
            hns.append(hn)
            cns.append(cn)
        x_tm = jnp.concatenate(dir_outs, axis=-1)
    return jnp.transpose(x_tm, (1, 0, 2)), (jnp.stack(hns), jnp.stack(cns))


# ----------------------------------- main ------------------------------------
if __name__ == "__main__":
    # Small shapes consistent with the module: batch=2, seq=8, embedding=4,
    # hidden_dim=32, n_layers=1, bidirectional -> per-direction H = 16.
    B, S, E = 2, 8, 4
    HIDDEN, NLAYERS, BIDIR = 32, 1, True

    key = jax.random.PRNGKey(0)
    key, k_in, k_params = jax.random.split(key, 3)

    encoder = PointerEncoderPallas(E, HIDDEN, NLAYERS, dropout=0.0,
                                   bidir=BIDIR, key=k_params)

    embedded_inputs = jax.random.normal(k_in, (B, S, E), jnp.float32)
    hidden0 = encoder.init_hidden(embedded_inputs)

    outputs, (h_n, c_n) = encoder.forward(embedded_inputs, hidden0)
    outputs = jax.block_until_ready(outputs)
    h_n = jax.block_until_ready(h_n)
    c_n = jax.block_until_ready(c_n)

    # sanity check against a pure-JAX reference LSTM
    ref_out, (ref_h, ref_c) = _forward_ref(encoder, embedded_inputs, hidden0)
    num_dirs = 2 if BIDIR else 1
    assert outputs.shape == (B, S, HIDDEN)
    assert h_n.shape == (NLAYERS * num_dirs, B, HIDDEN // num_dirs)
    assert jnp.allclose(outputs, ref_out, atol=1e-5, rtol=1e-5)
    assert jnp.allclose(h_n, ref_h, atol=1e-5, rtol=1e-5)
    assert jnp.allclose(c_n, ref_c, atol=1e-5, rtol=1e-5)

    print("KERNEL_OK")
</pallas_src>

<mosaic_0001>
module attributes {stable_mosaic.version = 11 : i64} {
  func.func @_lstm_recurrence_kernel(%arg0: i32, %arg1: i32, %arg2: i32, %arg3: memref<1x8x2x64xf32, #tpu.memory_space<vmem>>, %arg4: memref<1x16x64xf32, #tpu.memory_space<vmem>>, %arg5: memref<1x2x16xf32, #tpu.memory_space<vmem>>, %arg6: memref<1x2x16xf32, #tpu.memory_space<vmem>>, %arg7: memref<1x8x2x16xf32, #tpu.memory_space<vmem>>, %arg8: memref<1x2x16xf32, #tpu.memory_space<vmem>>, %arg9: memref<1x2x16xf32, #tpu.memory_space<vmem>>, %arg10: memref<2x16xf32, #tpu.memory_space<vmem>>, %arg11: memref<2x16xf32, #tpu.memory_space<vmem>>) attributes {dimension_semantics = [#tpu.dimension_semantics<parallel>, #tpu.dimension_semantics<parallel>, #tpu.dimension_semantics<arbitrary>], iteration_bounds = array<i64: 2, 1, 1>, scalar_prefetch = 0 : i64, scratch_operands = 2 : i64, tpu.core_type = #tpu.core_type<tc>, window_params = [{transform_indices = @transform_0, window_bounds = array<i64: 1, 8, 2, 64>}, {transform_indices = @transform_1, window_bounds = array<i64: 1, 16, 64>}, {transform_indices = @transform_2, window_bounds = array<i64: 1, 2, 16>}, {transform_indices = @transform_3, window_bounds = array<i64: 1, 2, 16>}, {transform_indices = @transform_4, window_bounds = array<i64: 1, 8, 2, 16>}, {transform_indices = @transform_5, window_bounds = array<i64: 1, 2, 16>}, {transform_indices = @transform_6, window_bounds = array<i64: 1, 2, 16>}]} {
    %c0_i32 = arith.constant 0 : i32
    %0 = arith.cmpi eq, %arg2, %c0_i32 : i32
    %1 = arith.extui %0 : i1 to i32
    %c0_i32_0 = arith.constant 0 : i32
    %2 = arith.cmpi ne, %1, %c0_i32_0 : i32
    scf.if %2 {
      %c0_16 = arith.constant 0 : index
      %c0_17 = arith.constant 0 : index
      %c0_18 = arith.constant 0 : index
      %19 = vector.load %arg5[%c0_16, %c0_17, %c0_18] : memref<1x2x16xf32, #tpu.memory_space<vmem>>, vector<1x2x16xf32>
      %20 = vector.shape_cast %19 : vector<1x2x16xf32> to vector<2x16xf32>
      %c0_19 = arith.constant 0 : index
      %c0_20 = arith.constant 0 : index
      %21 = vector.load %arg10[%c0_19, %c0_20] : memref<2x16xf32, #tpu.memory_space<vmem>>, vector<2x16xf32>
      tpu.vector_store %arg10[%c0_19, %c0_20], %20 {strides = array<i32>} : memref<2x16xf32, #tpu.memory_space<vmem>>, vector<2x16xf32>,
      %c0_21 = arith.constant 0 : index
      %c0_22 = arith.constant 0 : index
      %c0_23 = arith.constant 0 : index
      %22 = vector.load %arg6[%c0_21, %c0_22, %c0_23] : memref<1x2x16xf32, #tpu.memory_space<vmem>>, vector<1x2x16xf32>
      %23 = vector.shape_cast %22 : vector<1x2x16xf32> to vector<2x16xf32>
      %c0_24 = arith.constant 0 : index
      %c0_25 = arith.constant 0 : index
      %24 = vector.load %arg11[%c0_24, %c0_25] : memref<2x16xf32, #tpu.memory_space<vmem>>, vector<2x16xf32>
      tpu.vector_store %arg11[%c0_24, %c0_25], %23 {strides = array<i32>} : memref<2x16xf32, #tpu.memory_space<vmem>>, vector<2x16xf32>,
    } else {
    }
    %c0 = arith.constant 0 : index
    %c0_1 = arith.constant 0 : index
    %c0_2 = arith.constant 0 : index
    %3 = vector.load %arg4[%c0, %c0_1, %c0_2] : memref<1x16x64xf32, #tpu.memory_space<vmem>>, vector<1x16x64xf32>
    %4 = vector.shape_cast %3 : vector<1x16x64xf32> to vector<16x64xf32>
    %c0_i32_3 = arith.constant 0 : i32
    %5 = arith.cmpi eq, %arg0, %c0_i32_3 : i32
    %6 = arith.extui %5 : i1 to i32
    %c0_i32_4 = arith.constant 0 : i32
    %7 = arith.cmpi ne, %6, %c0_i32_4 : i32
    scf.if %7 {
      %c0_16 = arith.constant 0 : index
      %c0_17 = arith.constant 0 : index
      %19 = vector.load %arg10[%c0_16, %c0_17] : memref<2x16xf32, #tpu.memory_space<vmem>>, vector<2x16xf32>
      %c0_18 = arith.constant 0 : index
      %c0_19 = arith.constant 0 : index
      %20 = vector.load %arg11[%c0_18, %c0_19] : memref<2x16xf32, #tpu.memory_space<vmem>>, vector<2x16xf32>
      %c0_20 = arith.constant 0 : index
      %c0_21 = arith.constant 0 : index
      %c0_22 = arith.constant 0 : index
      %c0_23 = arith.constant 0 : index
      %21 = vector.load %arg3[%c0_20, %c0_21, %c0_22, %c0_23] : memref<1x8x2x64xf32, #tpu.memory_space<vmem>>, vector<1x1x2x64xf32>
      %22 = vector.shape_cast %21 : vector<1x1x2x64xf32> to vector<2x64xf32>
      %cst = arith.constant dense<0.000000e+00> : vector<2x64xf32>
      %23 = tpu.matmul %19, %4, %cst {dimension_numbers = #tpu.dot_dimension_numbers<[1], [0], [0], [1], [0, 0, 1, 1], [], []>} : vector<2x16xf32>, vector<16x64xf32>, vector<2x64xf32> -> vector<2x64xf32>
      %24 = arith.addf %22, %23 : vector<2x64xf32>
      %25 = vector.extract_strided_slice %24 {offsets = [0, 0], sizes = [2, 48], strides = [1, 1]} : vector<2x64xf32> to vector<2x48xf32>
      %26 = arith.negf %25 : vector<2x48xf32>
      %27 = math.exp %26 : vector<2x48xf32>
      %cst_24 = arith.constant 1.000000e+00 : f32
      %28 = vector.broadcast %cst_24 : f32 to vector<2x48xf32>
      %29 = arith.addf %28, %27 : vector<2x48xf32>
      %30 = arith.divf %28, %29 : vector<2x48xf32>
      %31 = vector.extract_strided_slice %24 {offsets = [0, 48], sizes = [2, 16], strides = [1, 1]} : vector<2x64xf32> to vector<2x16xf32>
      %32 = math.tanh %31 : vector<2x16xf32>
      %33 = vector.extract_strided_slice %30 {offsets = [0, 16], sizes = [2, 16], strides = [1, 1]} : vector<2x48xf32> to vector<2x16xf32>
      %34 = arith.mulf %33, %20 : vector<2x16xf32>
      %35 = vector.extract_strided_slice %30 {offsets = [0, 0], sizes = [2, 16], strides = [1, 1]} : vector<2x48xf32> to vector<2x16xf32>
      %36 = arith.mulf %35, %32 : vector<2x16xf32>
      %37 = arith.addf %34, %36 : vector<2x16xf32>
      %38 = vector.extract_strided_slice %30 {offsets = [0, 32], sizes = [2, 16], strides = [1, 1]} : vector<2x48xf32> to vector<2x16xf32>
      %39 = math.tanh %37 : vector<2x16xf32>
      %40 = arith.mulf %38, %39 : vector<2x16xf32>
      %c0_25 = arith.constant 0 : index
      %c0_26 = arith.constant 0 : index
      %c0_27 = arith.constant 0 : index
      %c0_28 = arith.constant 0 : index
      %41 = vector.load %arg7[%c0_25, %c0_26, %c0_27, %c0_28] : memref<1x8x2x16xf32, #tpu.memory_space<vmem>>, vector<1x1x2x16xf32>
      %42 = vector.shape_cast %41 : vector<1x1x2x16xf32> to vector<2x16xf32>
      %43 = vector.shape_cast %40 : vector<2x16xf32> to vector<1x1x2x16xf32>
      tpu.vector_store %arg7[%c0_25, %c0_26, %c0_27, %c0_28], %43 {strides = array<i32>} : memref<1x8x2x16xf32, #tpu.memory_space<vmem>>, vector<1x1x2x16xf32>,
      %c0_29 = arith.constant 0 : index
      %c1 = arith.constant 1 : index
      %c0_30 = arith.constant 0 : index
      %c0_31 = arith.constant 0 : index
      %44 = vector.load %arg3[%c0_29, %c1, %c0_30, %c0_31] : memref<1x8x2x64xf32, #tpu.memory_space<vmem>>, vector<1x1x2x64xf32>
      %45 = vector.shape_cast %44 : vector<1x1x2x64xf32> to vector<2x64xf32>
      %cst_32 = arith.constant dense<0.000000e+00> : vector<2x64xf32>
      %46 = tpu.matmul %40, %4, %cst_32 {dimension_numbers = #tpu.dot_dimension_numbers<[1], [0], [0], [1], [0, 0, 1, 1], [], []>} : vector<2x16xf32>, vector<16x64xf32>, vector<2x64xf32> -> vector<2x64xf32>
      %47 = arith.addf %45, %46 : vector<2x64xf32>
      %48 = vector.extract_strided_slice %47 {offsets = [0, 0], sizes = [2, 48], strides = [1, 1]} : vector<2x64xf32> to vector<2x48xf32>
      %49 = arith.negf %48 : vector<2x48xf32>
      %50 = math.exp %49 : vector<2x48xf32>
      %cst_33 = arith.constant 1.000000e+00 : f32
      %51 = vector.broadcast %cst_33 : f32 to vector<2x48xf32>
      %52 = arith.addf %51, %50 : vector<2x48xf32>
      %53 = arith.divf %51, %52 : vector<2x48xf32>
      %54 = vector.extract_strided_slice %47 {offsets = [0, 48], sizes = [2, 16], strides = [1, 1]} : vector<2x64xf32> to vector<2x16xf32>
      %55 = math.tanh %54 : vector<2x16xf32>
      %56 = vector.extract_strided_slice %53 {offsets = [0, 16], sizes = [2, 16], strides = [1, 1]} : vector<2x48xf32> to vector<2x16xf32>
      %57 = arith.mulf %56, %37 : vector<2x16xf32>
      %58 = vector.extract_strided_slice %53 {offsets = [0, 0], sizes = [2, 16], strides = [1, 1]} : vector<2x48xf32> to vector<2x16xf32>
      %59 = arith.mulf %58, %55 : vector<2x16xf32>
      %60 = arith.addf %57, %59 : vector<2x16xf32>
      %61 = vector.extract_strided_slice %53 {offsets = [0, 32], sizes = [2, 16], strides = [1, 1]} : vector<2x48xf32> to vector<2x16xf32>
      %62 = math.tanh %60 : vector<2x16xf32>
      %63 = arith.mulf %61, %62 : vector<2x16xf32>
      %c0_34 = arith.constant 0 : index
      %c1_35 = arith.constant 1 : index
      %c0_36 = arith.constant 0 : index
      %c0_37 = arith.constant 0 : index
      %64 = vector.load %arg7[%c0_34, %c1_35, %c0_36, %c0_37] : memref<1x8x2x16xf32, #tpu.memory_space<vmem>>, vector<1x1x2x16xf32>
      %65 = vector.shape_cast %64 : vector<1x1x2x16xf32> to vector<2x16xf32>
      %66 = vector.shape_cast %63 : vector<2x16xf32> to vector<1x1x2x16xf32>
      tpu.vector_store %arg7[%c0_34, %c1_35, %c0_36, %c0_37], %66 {strides = array<i32>} : memref<1x8x2x16xf32, #tpu.memory_space<vmem>>, vector<1x1x2x16xf32>,
      %c0_38 = arith.constant 0 : index
      %c2 = arith.constant 2 : index
      %c0_39 = arith.constant 0 : index
      %c0_40 = arith.constant 0 : index
      %67 = vector.load %arg3[%c0_38, %c2, %c0_39, %c0_40] : memref<1x8x2x64xf32, #tpu.memory_space<vmem>>, vector<1x1x2x64xf32>
      %68 = vector.shape_cast %67 : vector<1x1x2x64xf32> to vector<2x64xf32>
      %cst_41 = arith.constant dense<0.000000e+00> : vector<2x64xf32>
      %69 = tpu.matmul %63, %4, %cst_41 {dimension_numbers = #tpu.dot_dimension_numbers<[1], [0], [0], [1], [0, 0, 1, 1], [], []>} : vector<2x16xf32>, vector<16x64xf32>, vector<2x64xf32> -> vector<2x64xf32>
      %70 = arith.addf %68, %69 : vector<2x64xf32>
      %71 = vector.extract_strided_slice %70 {offsets = [0, 0], sizes = [2, 48], strides = [1, 1]} : vector<2x64xf32> to vector<2x48xf32>
      %72 = arith.negf %71 : vector<2x48xf32>
      %73 = math.exp %72 : vector<2x48xf32>
      %cst_42 = arith.constant 1.000000e+00 : f32
      %74 = vector.broadcast %cst_42 : f32 to vector<2x48xf32>
      %75 = arith.addf %74, %73 : vector<2x48xf32>
      %76 = arith.divf %74, %75 : vector<2x48xf32>
      %77 = vector.extract_strided_slice %70 {offsets = [0, 48], sizes = [2, 16], strides = [1, 1]} : vector<2x64xf32> to vector<2x16xf32>
      %78 = math.tanh %77 : vector<2x16xf32>
      %79 = vector.extract_strided_slice %76 {offsets = [0, 16], sizes = [2, 16], strides = [1, 1]} : vector<2x48xf32> to vector<2x16xf32>
      %80 = arith.mulf %79, %60 : vector<2x16xf32>
      %81 = vector.extract_strided_slice %76 {offsets = [0, 0], sizes = [2, 16], strides = [1, 1]} : vector<2x48xf32> to vector<2x16xf32>
      %82 = arith.mulf %81, %78 : vector<2x16xf32>
      %83 = arith.addf %80, %82 : vector<2x16xf32>
      %84 = vector.extract_strided_slice %76 {offsets = [0, 32], sizes = [2, 16], strides = [1, 1]} : vector<2x48xf32> to vector<2x16xf32>
      %85 = math.tanh %83 : vector<2x16xf32>
      %86 = arith.mulf %84, %85 : vector<2x16xf32>
      %c0_43 = arith.constant 0 : index
      %c2_44 = arith.constant 2 : index
      %c0_45 = arith.constant 0 : index
      %c0_46 = arith.constant 0 : index
      %87 = vector.load %arg7[%c0_43, %c2_44, %c0_45, %c0_46] : memref<1x8x2x16xf32, #tpu.memory_space<vmem>>, vector<1x1x2x16xf32>
      %88 = vector.shape_cast %87 : vector<1x1x2x16xf32> to vector<2x16xf32>
      %89 = vector.shape_cast %86 : vector<2x16xf32> to vector<1x1x2x16xf32>
      tpu.vector_store %arg7[%c0_43, %c2_44, %c0_45, %c0_46], %89 {strides = array<i32>} : memref<1x8x2x16xf32, #tpu.memory_space<vmem>>, vector<1x1x2x16xf32>,
      %c0_47 = arith.constant 0 : index
      %c3 = arith.constant 3 : index
      %c0_48 = arith.constant 0 : index
      %c0_49 = arith.constant 0 : index
      %90 = vector.load %arg3[%c0_47, %c3, %c0_48, %c0_49] : memref<1x8x2x64xf32, #tpu.memory_space<vmem>>, vector<1x1x2x64xf32>
      %91 = vector.shape_cast %90 : vector<1x1x2x64xf32> to vector<2x64xf32>
      %cst_50 = arith.constant dense<0.000000e+00> : vector<2x64xf32>
      %92 = tpu.matmul %86, %4, %cst_50 {dimension_numbers = #tpu.dot_dimension_numbers<[1], [0], [0], [1], [0, 0, 1, 1], [], []>} : vector<2x16xf32>, vector<16x64xf32>, vector<2x64xf32> -> vector<2x64xf32>
      %93 = arith.addf %91, %92 : vector<2x64xf32>
      %94 = vector.extract_strided_slice %93 {offsets = [0, 0], sizes = [2, 48], strides = [1, 1]} : vector<2x64xf32> to vector<2x48xf32>
      %95 = arith.negf %94 : vector<2x48xf32>
      %96 = math.exp %95 : vector<2x48xf32>
      %cst_51 = arith.constant 1.000000e+00 : f32
      %97 = vector.broadcast %cst_51 : f32 to vector<2x48xf32>
      %98 = arith.addf %97, %96 : vector<2x48xf32>
      %99 = arith.divf %97, %98 : vector<2x48xf32>
      %100 = vector.extract_strided_slice %93 {offsets = [0, 48], sizes = [2, 16], strides = [1, 1]} : vector<2x64xf32> to vector<2x16xf32>
      %101 = math.tanh %100 : vector<2x16xf32>
      %102 = vector.extract_strided_slice %99 {offsets = [0, 16], sizes = [2, 16], strides = [1, 1]} : vector<2x48xf32> to vector<2x16xf32>
      %103 = arith.mulf %102, %83 : vector<2x16xf32>
      %104 = vector.extract_strided_slice %99 {offsets = [0, 0], sizes = [2, 16], strides = [1, 1]} : vector<2x48xf32> to vector<2x16xf32>
      %105 = arith.mulf %104, %101 : vector<2x16xf32>
      %106 = arith.addf %103, %105 : vector<2x16xf32>
      %107 = vector.extract_strided_slice %99 {offsets = [0, 32], sizes = [2, 16], strides = [1, 1]} : vector<2x48xf32> to vector<2x16xf32>
      %108 = math.tanh %106 : vector<2x16xf32>
      %109 = arith.mulf %107, %108 : vector<2x16xf32>
      %c0_52 = arith.constant 0 : index
      %c3_53 = arith.constant 3 : index
      %c0_54 = arith.constant 0 : index
      %c0_55 = arith.constant 0 : index
      %110 = vector.load %arg7[%c0_52, %c3_53, %c0_54, %c0_55] : memref<1x8x2x16xf32, #tpu.memory_space<vmem>>, vector<1x1x2x16xf32>
      %111 = vector.shape_cast %110 : vector<1x1x2x16xf32> to vector<2x16xf32>
      %112 = vector.shape_cast %109 : vector<2x16xf32> to vector<1x1x2x16xf32>
      tpu.vector_store %arg7[%c0_52, %c3_53, %c0_54, %c0_55], %112 {strides = array<i32>} : memref<1x8x2x16xf32, #tpu.memory_space<vmem>>, vector<1x1x2x16xf32>,
      %c0_56 = arith.constant 0 : index
      %c4 = arith.constant 4 : index
      %c0_57 = arith.constant 0 : index
      %c0_58 = arith.constant 0 : index
      %113 = vector.load %arg3[%c0_56, %c4, %c0_57, %c0_58] : memref<1x8x2x64xf32, #tpu.memory_space<vmem>>, vector<1x1x2x64xf32>
      %114 = vector.shape_cast %113 : vector<1x1x2x64xf32> to vector<2x64xf32>
      %cst_59 = arith.constant dense<0.000000e+00> : vector<2x64xf32>
      %115 = tpu.matmul %109, %4, %cst_59 {dimension_numbers = #tpu.dot_dimension_numbers<[1], [0], [0], [1], [0, 0, 1, 1], [], []>} : vector<2x16xf32>, vector<16x64xf32>, vector<2x64xf32> -> vector<2x64xf32>
      %116 = arith.addf %114, %115 : vector<2x64xf32>
      %117 = vector.extract_strided_slice %116 {offsets = [0, 0], sizes = [2, 48], strides = [1, 1]} : vector<2x64xf32> to vector<2x48xf32>
      %118 = arith.negf %117 : vector<2x48xf32>
      %119 = math.exp %118 : vector<2x48xf32>
      %cst_60 = arith.constant 1.000000e+00 : f32
      %120 = vector.broadcast %cst_60 : f32 to vector<2x48xf32>
      %121 = arith.addf %120, %119 : vector<2x48xf32>
      %122 = arith.divf %120, %121 : vector<2x48xf32>
      %123 = vector.extract_strided_slice %116 {offsets = [0, 48], sizes = [2, 16], strides = [1, 1]} : vector<2x64xf32> to vector<2x16xf32>
      %124 = math.tanh %123 : vector<2x16xf32>
      %125 = vector.extract_strided_slice %122 {offsets = [0, 16], sizes = [2, 16], strides = [1, 1]} : vector<2x48xf32> to vector<2x16xf32>
      %126 = arith.mulf %125, %106 : vector<2x16xf32>
      %127 = vector.extract_strided_slice %122 {offsets = [0, 0], sizes = [2, 16], strides = [1, 1]} : vector<2x48xf32> to vector<2x16xf32>
      %128 = arith.mulf %127, %124 : vector<2x16xf32>
      %129 = arith.addf %126, %128 : vector<2x16xf32>
      %130 = vector.extract_strided_slice %122 {offsets = [0, 32], sizes = [2, 16], strides = [1, 1]} : vector<2x48xf32> to vector<2x16xf32>
      %131 = math.tanh %129 : vector<2x16xf32>
      %132 = arith.mulf %130, %131 : vector<2x16xf32>
      %c0_61 = arith.constant 0 : index
      %c4_62 = arith.constant 4 : index
      %c0_63 = arith.constant 0 : index
      %c0_64 = arith.constant 0 : index
      %133 = vector.load %arg7[%c0_61, %c4_62, %c0_63, %c0_64] : memref<1x8x2x16xf32, #tpu.memory_space<vmem>>, vector<1x1x2x16xf32>
      %134 = vector.shape_cast %133 : vector<1x1x2x16xf32> to vector<2x16xf32>
      %135 = vector.shape_cast %132 : vector<2x16xf32> to vector<1x1x2x16xf32>
      tpu.vector_store %arg7[%c0_61, %c4_62, %c0_63, %c0_64], %135 {strides = array<i32>} : memref<1x8x2x16xf32, #tpu.memory_space<vmem>>, vector<1x1x2x16xf32>,
      %c0_65 = arith.constant 0 : index
      %c5 = arith.constant 5 : index
      %c0_66 = arith.constant 0 : index
      %c0_67 = arith.constant 0 : index
      %136 = vector.load %arg3[%c0_65, %c5, %c0_66, %c0_67] : memref<1x8x2x64xf32, #tpu.memory_space<vmem>>, vector<1x1x2x64xf32>
      %137 = vector.shape_cast %136 : vector<1x1x2x64xf32> to vector<2x64xf32>
      %cst_68 = arith.constant dense<0.000000e+00> : vector<2x64xf32>
      %138 = tpu.matmul %132, %4, %cst_68 {dimension_numbers = #tpu.dot_dimension_numbers<[1], [0], [0], [1], [0, 0, 1, 1], [], []>} : vector<2x16xf32>, vector<16x64xf32>, vector<2x64xf32> -> vector<2x64xf32>
      %139 = arith.addf %137, %138 : vector<2x64xf32>
      %140 = vector.extract_strided_slice %139 {offsets = [0, 0], sizes = [2, 48], strides = [1, 1]} : vector<2x64xf32> to vector<2x48xf32>
      %141 = arith.negf %140 : vector<2x48xf32>
      %142 = math.exp %141 : vector<2x48xf32>
      %cst_69 = arith.constant 1.000000e+00 : f32
      %143 = vector.broadcast %cst_69 : f32 to vector<2x48xf32>
      %144 = arith.addf %143, %142 : vector<2x48xf32>
      %145 = arith.divf %143, %144 : vector<2x48xf32>
      %146 = vector.extract_strided_slice %139 {offsets = [0, 48], sizes = [2, 16], strides = [1, 1]} : vector<2x64xf32> to vector<2x16xf32>
      %147 = math.tanh %146 : vector<2x16xf32>
      %148 = vector.extract_strided_slice %145 {offsets = [0, 16], sizes = [2, 16], strides = [1, 1]} : vector<2x48xf32> to vector<2x16xf32>
      %149 = arith.mulf %148, %129 : vector<2x16xf32>
      %150 = vector.extract_strided_slice %145 {offsets = [0, 0], sizes = [2, 16], strides = [1, 1]} : vector<2x48xf32> to vector<2x16xf32>
      %151 = arith.mulf %150, %147 : vector<2x16xf32>
      %152 = arith.addf %149, %151 : vector<2x16xf32>
      %153 = vector.extract_strided_slice %145 {offsets = [0, 32], sizes = [2, 16], strides = [1, 1]} : vector<2x48xf32> to vector<2x16xf32>
      %154 = math.tanh %152 : vector<2x16xf32>
      %155 = arith.mulf %153, %154 : vector<2x16xf32>
      %c0_70 = arith.constant 0 : index
      %c5_71 = arith.constant 5 : index
      %c0_72 = arith.constant 0 : index
      %c0_73 = arith.constant 0 : index
      %156 = vector.load %arg7[%c0_70, %c5_71, %c0_72, %c0_73] : memref<1x8x2x16xf32, #tpu.memory_space<vmem>>, vector<1x1x2x16xf32>
      %157 = vector.shape_cast %156 : vector<1x1x2x16xf32> to vector<2x16xf32>
      %158 = vector.shape_cast %155 : vector<2x16xf32> to vector<1x1x2x16xf32>
      tpu.vector_store %arg7[%c0_70, %c5_71, %c0_72, %c0_73], %158 {strides = array<i32>} : memref<1x8x2x16xf32, #tpu.memory_space<vmem>>, vector<1x1x2x16xf32>,
      %c0_74 = arith.constant 0 : index
      %c6 = arith.constant 6 : index
      %c0_75 = arith.constant 0 : index
      %c0_76 = arith.constant 0 : index
      %159 = vector.load %arg3[%c0_74, %c6, %c0_75, %c0_76] : memref<1x8x2x64xf32, #tpu.memory_space<vmem>>, vector<1x1x2x64xf32>
      %160 = vector.shape_cast %159 : vector<1x1x2x64xf32> to vector<2x64xf32>
      %cst_77 = arith.constant dense<0.000000e+00> : vector<2x64xf32>
      %161 = tpu.matmul %155, %4, %cst_77 {dimension_numbers = #tpu.dot_dimension_numbers<[1], [0], [0], [1], [0, 0, 1, 1], [], []>} : vector<2x16xf32>, vector<16x64xf32>, vector<2x64xf32> -> vector<2x64xf32>
      %162 = arith.addf %160, %161 : vector<2x64xf32>
      %163 = vector.extract_strided_slice %162 {offsets = [0, 0], sizes = [2, 48], strides = [1, 1]} : vector<2x64xf32> to vector<2x48xf32>
      %164 = arith.negf %163 : vector<2x48xf32>
      %165 = math.exp %164 : vector<2x48xf32>
      %cst_78 = arith.constant 1.000000e+00 : f32
      %166 = vector.broadcast %cst_78 : f32 to vector<2x48xf32>
      %167 = arith.addf %166, %165 : vector<2x48xf32>
      %168 = arith.divf %166, %167 : vector<2x48xf32>
      %169 = vector.extract_strided_slice %162 {offsets = [0, 48], sizes = [2, 16], strides = [1, 1]} : vector<2x64xf32> to vector<2x16xf32>
      %170 = math.tanh %169 : vector<2x16xf32>
      %171 = vector.extract_strided_slice %168 {offsets = [0, 16], sizes = [2, 16], strides = [1, 1]} : vector<2x48xf32> to vector<2x16xf32>
      %172 = arith.mulf %171, %152 : vector<2x16xf32>
      %173 = vector.extract_strided_slice %168 {offsets = [0, 0], sizes = [2, 16], strides = [1, 1]} : vector<2x48xf32> to vector<2x16xf32>
      %174 = arith.mulf %173, %170 : vector<2x16xf32>
      %175 = arith.addf %172, %174 : vector<2x16xf32>
      %176 = vector.extract_strided_slice %168 {offsets = [0, 32], sizes = [2, 16], strides = [1, 1]} : vector<2x48xf32> to vector<2x16xf32>
      %177 = math.tanh %175 : vector<2x16xf32>
      %178 = arith.mulf %176, %177 : vector<2x16xf32>
      %c0_79 = arith.constant 0 : index
      %c6_80 = arith.constant 6 : index
      %c0_81 = arith.constant 0 : index
      %c0_82 = arith.constant 0 : index
      %179 = vector.load %arg7[%c0_79, %c6_80, %c0_81, %c0_82] : memref<1x8x2x16xf32, #tpu.memory_space<vmem>>, vector<1x1x2x16xf32>
      %180 = vector.shape_cast %179 : vector<1x1x2x16xf32> to vector<2x16xf32>
      %181 = vector.shape_cast %178 : vector<2x16xf32> to vector<1x1x2x16xf32>
      tpu.vector_store %arg7[%c0_79, %c6_80, %c0_81, %c0_82], %181 {strides = array<i32>} : memref<1x8x2x16xf32, #tpu.memory_space<vmem>>, vector<1x1x2x16xf32>,
      %c0_83 = arith.constant 0 : index
      %c7 = arith.constant 7 : index
      %c0_84 = arith.constant 0 : index
      %c0_85 = arith.constant 0 : index
      %182 = vector.load %arg3[%c0_83, %c7, %c0_84, %c0_85] : memref<1x8x2x64xf32, #tpu.memory_space<vmem>>, vector<1x1x2x64xf32>
      %183 = vector.shape_cast %182 : vector<1x1x2x64xf32> to vector<2x64xf32>
      %cst_86 = arith.constant dense<0.000000e+00> : vector<2x64xf32>
      %184 = tpu.matmul %178, %4, %cst_86 {dimension_numbers = #tpu.dot_dimension_numbers<[1], [0], [0], [1], [0, 0, 1, 1], [], []>} : vector<2x16xf32>, vector<16x64xf32>, vector<2x64xf32> -> vector<2x64xf32>
      %185 = arith.addf %183, %184 : vector<2x64xf32>
      %186 = vector.extract_strided_slice %185 {offsets = [0, 0], sizes = [2, 48], strides = [1, 1]} : vector<2x64xf32> to vector<2x48xf32>
      %187 = arith.negf %186 : vector<2x48xf32>
      %188 = math.exp %187 : vector<2x48xf32>
      %cst_87 = arith.constant 1.000000e+00 : f32
      %189 = vector.broadcast %cst_87 : f32 to vector<2x48xf32>
      %190 = arith.addf %189, %188 : vector<2x48xf32>
      %191 = arith.divf %189, %190 : vector<2x48xf32>
      %192 = vector.extract_strided_slice %185 {offsets = [0, 48], sizes = [2, 16], strides = [1, 1]} : vector<2x64xf32> to vector<2x16xf32>
      %193 = math.tanh %192 : vector<2x16xf32>
      %194 = vector.extract_strided_slice %191 {offsets = [0, 16], sizes = [2, 16], strides = [1, 1]} : vector<2x48xf32> to vector<2x16xf32>
      %195 = arith.mulf %194, %175 : vector<2x16xf32>
      %196 = vector.extract_strided_slice %191 {offsets = [0, 0], sizes = [2, 16], strides = [1, 1]} : vector<2x48xf32> to vector<2x16xf32>
      %197 = arith.mulf %196, %193 : vector<2x16xf32>
      %198 = arith.addf %195, %197 : vector<2x16xf32>
      %199 = vector.extract_strided_slice %191 {offsets = [0, 32], sizes = [2, 16], strides = [1, 1]} : vector<2x48xf32> to vector<2x16xf32>
      %200 = math.tanh %198 : vector<2x16xf32>
      %201 = arith.mulf %199, %200 : vector<2x16xf32>
      %c0_88 = arith.constant 0 : index
      %c7_89 = arith.constant 7 : index
      %c0_90 = arith.constant 0 : index
      %c0_91 = arith.constant 0 : index
      %202 = vector.load %arg7[%c0_88, %c7_89, %c0_90, %c0_91] : memref<1x8x2x16xf32, #tpu.memory_space<vmem>>, vector<1x1x2x16xf32>
      %203 = vector.shape_cast %202 : vector<1x1x2x16xf32> to vector<2x16xf32>
      %204 = vector.shape_cast %201 : vector<2x16xf32> to vector<1x1x2x16xf32>
      tpu.vector_store %arg7[%c0_88, %c7_89, %c0_90, %c0_91], %204 {strides = array<i32>} : memref<1x8x2x16xf32, #tpu.memory_space<vmem>>, vector<1x1x2x16xf32>,
      %c0_92 = arith.constant 0 : index
      %c0_93 = arith.constant 0 : index
      %205 = vector.load %arg10[%c0_92, %c0_93] : memref<2x16xf32, #tpu.memory_space<vmem>>, vector<2x16xf32>
      tpu.vector_store %arg10[%c0_92, %c0_93], %201 {strides = array<i32>} : memref<2x16xf32, #tpu.memory_space<vmem>>, vector<2x16xf32>,
      %c0_94 = arith.constant 0 : index
      %c0_95 = arith.constant 0 : index
      %206 = vector.load %arg11[%c0_94, %c0_95] : memref<2x16xf32, #tpu.memory_space<vmem>>, vector<2x16xf32>
      tpu.vector_store %arg11[%c0_94, %c0_95], %198 {strides = array<i32>} : memref<2x16xf32, #tpu.memory_space<vmem>>, vector<2x16xf32>,
    } else {
    }
    %c1_i32 = arith.constant 1 : i32
    %8 = arith.cmpi eq, %arg0, %c1_i32 : i32
    %9 = arith.extui %8 : i1 to i32
    %c0_i32_5 = arith.constant 0 : i32
    %10 = arith.cmpi ne, %9, %c0_i32_5 : i32
    scf.if %10 {
      %c0_16 = arith.constant 0 : index
      %c0_17 = arith.constant 0 : index
      %19 = vector.load %arg10[%c0_16, %c0_17] : memref<2x16xf32, #tpu.memory_space<vmem>>, vector<2x16xf32>
      %c0_18 = arith.constant 0 : index
      %c0_19 = arith.constant 0 : index
      %20 = vector.load %arg11[%c0_18, %c0_19] : memref<2x16xf32, #tpu.memory_space<vmem>>, vector<2x16xf32>
      %c0_20 = arith.constant 0 : index
      %c7 = arith.constant 7 : index
      %c0_21 = arith.constant 0 : index
      %c0_22 = arith.constant 0 : index
      %21 = vector.load %arg3[%c0_20, %c7, %c0_21, %c0_22] : memref<1x8x2x64xf32, #tpu.memory_space<vmem>>, vector<1x1x2x64xf32>
      %22 = vector.shape_cast %21 : vector<1x1x2x64xf32> to vector<2x64xf32>
      %cst = arith.constant dense<0.000000e+00> : vector<2x64xf32>
      %23 = tpu.matmul %19, %4, %cst {dimension_numbers = #tpu.dot_dimension_numbers<[1], [0], [0], [1], [0, 0, 1, 1], [], []>} : vector<2x16xf32>, vector<16x64xf32>, vector<2x64xf32> -> vector<2x64xf32>
      %24 = arith.addf %22, %23 : vector<2x64xf32>
      %25 = vector.extract_strided_slice %24 {offsets = [0, 0], sizes = [2, 48], strides = [1, 1]} : vector<2x64xf32> to vector<2x48xf32>
      %26 = arith.negf %25 : vector<2x48xf32>
      %27 = math.exp %26 : vector<2x48xf32>
      %cst_23 = arith.constant 1.000000e+00 : f32
      %28 = vector.broadcast %cst_23 : f32 to vector<2x48xf32>
      %29 = arith.addf %28, %27 : vector<2x48xf32>
      %30 = arith.divf %28, %29 : vector<2x48xf32>
      %31 = vector.extract_strided_slice %24 {offsets = [0, 48], sizes = [2, 16], strides = [1, 1]} : vector<2x64xf32> to vector<2x16xf32>
      %32 = math.tanh %31 : vector<2x16xf32>
      %33 = vector.extract_strided_slice %30 {offsets = [0, 16], sizes = [2, 16], strides = [1, 1]} : vector<2x48xf32> to vector<2x16xf32>
      %34 = arith.mulf %33, %20 : vector<2x16xf32>
      %35 = vector.extract_strided_slice %30 {offsets = [0, 0], sizes = [2, 16], strides = [1, 1]} : vector<2x48xf32> to vector<2x16xf32>
      %36 = arith.mulf %35, %32 : vector<2x16xf32>
      %37 = arith.addf %34, %36 : vector<2x16xf32>
      %38 = vector.extract_strided_slice %30 {offsets = [0, 32], sizes = [2, 16], strides = [1, 1]} : vector<2x48xf32> to vector<2x16xf32>
      %39 = math.tanh %37 : vector<2x16xf32>
      %40 = arith.mulf %38, %39 : vector<2x16xf32>
      %c0_24 = arith.constant 0 : index
      %c7_25 = arith.constant 7 : index
      %c0_26 = arith.constant 0 : index
      %c0_27 = arith.constant 0 : index
      %41 = vector.load %arg7[%c0_24, %c7_25, %c0_26, %c0_27] : memref<1x8x2x16xf32, #tpu.memory_space<vmem>>, vector<1x1x2x16xf32>
      %42 = vector.shape_cast %41 : vector<1x1x2x16xf32> to vector<2x16xf32>
      %43 = vector.shape_cast %40 : vector<2x16xf32> to vector<1x1x2x16xf32>
      tpu.vector_store %arg7[%c0_24, %c7_25, %c0_26, %c0_27], %43 {strides = array<i32>} : memref<1x8x2x16xf32, #tpu.memory_space<vmem>>, vector<1x1x2x16xf32>,
      %c0_28 = arith.constant 0 : index
      %c6 = arith.constant 6 : index
      %c0_29 = arith.constant 0 : index
      %c0_30 = arith.constant 0 : index
      %44 = vector.load %arg3[%c0_28, %c6, %c0_29, %c0_30] : memref<1x8x2x64xf32, #tpu.memory_space<vmem>>, vector<1x1x2x64xf32>
      %45 = vector.shape_cast %44 : vector<1x1x2x64xf32> to vector<2x64xf32>
      %cst_31 = arith.constant dense<0.000000e+00> : vector<2x64xf32>
      %46 = tpu.matmul %40, %4, %cst_31 {dimension_numbers = #tpu.dot_dimension_numbers<[1], [0], [0], [1], [0, 0, 1, 1], [], []>} : vector<2x16xf32>, vector<16x64xf32>, vector<2x64xf32> -> vector<2x64xf32>
      %47 = arith.addf %45, %46 : vector<2x64xf32>
      %48 = vector.extract_strided_slice %47 {offsets = [0, 0], sizes = [2, 48], strides = [1, 1]} : vector<2x64xf32> to vector<2x48xf32>
      %49 = arith.negf %48 : vector<2x48xf32>
      %50 = math.exp %49 : vector<2x48xf32>
      %cst_32 = arith.constant 1.000000e+00 : f32
      %51 = vector.broadcast %cst_32 : f32 to vector<2x48xf32>
      %52 = arith.addf %51, %50 : vector<2x48xf32>
      %53 = arith.divf %51, %52 : vector<2x48xf32>
      %54 = vector.extract_strided_slice %47 {offsets = [0, 48], sizes = [2, 16], strides = [1, 1]} : vector<2x64xf32> to vector<2x16xf32>
      %55 = math.tanh %54 : vector<2x16xf32>
      %56 = vector.extract_strided_slice %53 {offsets = [0, 16], sizes = [2, 16], strides = [1, 1]} : vector<2x48xf32> to vector<2x16xf32>
      %57 = arith.mulf %56, %37 : vector<2x16xf32>
      %58 = vector.extract_strided_slice %53 {offsets = [0, 0], sizes = [2, 16], strides = [1, 1]} : vector<2x48xf32> to vector<2x16xf32>
      %59 = arith.mulf %58, %55 : vector<2x16xf32>
      %60 = arith.addf %57, %59 : vector<2x16xf32>
      %61 = vector.extract_strided_slice %53 {offsets = [0, 32], sizes = [2, 16], strides = [1, 1]} : vector<2x48xf32> to vector<2x16xf32>
      %62 = math.tanh %60 : vector<2x16xf32>
      %63 = arith.mulf %61, %62 : vector<2x16xf32>
      %c0_33 = arith.constant 0 : index
      %c6_34 = arith.constant 6 : index
      %c0_35 = arith.constant 0 : index
      %c0_36 = arith.constant 0 : index
      %64 = vector.load %arg7[%c0_33, %c6_34, %c0_35, %c0_36] : memref<1x8x2x16xf32, #tpu.memory_space<vmem>>, vector<1x1x2x16xf32>
      %65 = vector.shape_cast %64 : vector<1x1x2x16xf32> to vector<2x16xf32>
      %66 = vector.shape_cast %63 : vector<2x16xf32> to vector<1x1x2x16xf32>
      tpu.vector_store %arg7[%c0_33, %c6_34, %c0_35, %c0_36], %66 {strides = array<i32>} : memref<1x8x2x16xf32, #tpu.memory_space<vmem>>, vector<1x1x2x16xf32>,
      %c0_37 = arith.constant 0 : index
      %c5 = arith.constant 5 : index
      %c0_38 = arith.constant 0 : index
      %c0_39 = arith.constant 0 : index
      %67 = vector.load %arg3[%c0_37, %c5, %c0_38, %c0_39] : memref<1x8x2x64xf32, #tpu.memory_space<vmem>>, vector<1x1x2x64xf32>
      %68 = vector.shape_cast %67 : vector<1x1x2x64xf32> to vector<2x64xf32>
      %cst_40 = arith.constant dense<0.000000e+00> : vector<2x64xf32>
      %69 = tpu.matmul %63, %4, %cst_40 {dimension_numbers = #tpu.dot_dimension_numbers<[1], [0], [0], [1], [0, 0, 1, 1], [], []>} : vector<2x16xf32>, vector<16x64xf32>, vector<2x64xf32> -> vector<2x64xf32>
      %70 = arith.addf %68, %69 : vector<2x64xf32>
      %71 = vector.extract_strided_slice %70 {offsets = [0, 0], sizes = [2, 48], strides = [1, 1]} : vector<2x64xf32> to vector<2x48xf32>
      %72 = arith.negf %71 : vector<2x48xf32>
      %73 = math.exp %72 : vector<2x48xf32>
      %cst_41 = arith.constant 1.000000e+00 : f32
      %74 = vector.broadcast %cst_41 : f32 to vector<2x48xf32>
      %75 = arith.addf %74, %73 : vector<2x48xf32>
      %76 = arith.divf %74, %75 : vector<2x48xf32>
      %77 = vector.extract_strided_slice %70 {offsets = [0, 48], sizes = [2, 16], strides = [1, 1]} : vector<2x64xf32> to vector<2x16xf32>
      %78 = math.tanh %77 : vector<2x16xf32>
      %79 = vector.extract_strided_slice %76 {offsets = [0, 16], sizes = [2, 16], strides = [1, 1]} : vector<2x48xf32> to vector<2x16xf32>
      %80 = arith.mulf %79, %60 : vector<2x16xf32>
      %81 = vector.extract_strided_slice %76 {offsets = [0, 0], sizes = [2, 16], strides = [1, 1]} : vector<2x48xf32> to vector<2x16xf32>
      %82 = arith.mulf %81, %78 : vector<2x16xf32>
      %83 = arith.addf %80, %82 : vector<2x16xf32>
      %84 = vector.extract_strided_slice %76 {offsets = [0, 32], sizes = [2, 16], strides = [1, 1]} : vector<2x48xf32> to vector<2x16xf32>
      %85 = math.tanh %83 : vector<2x16xf32>
      %86 = arith.mulf %84, %85 : vector<2x16xf32>
      %c0_42 = arith.constant 0 : index
      %c5_43 = arith.constant 5 : index
      %c0_44 = arith.constant 0 : index
      %c0_45 = arith.constant 0 : index
      %87 = vector.load %arg7[%c0_42, %c5_43, %c0_44, %c0_45] : memref<1x8x2x16xf32, #tpu.memory_space<vmem>>, vector<1x1x2x16xf32>
      %88 = vector.shape_cast %87 : vector<1x1x2x16xf32> to vector<2x16xf32>
      %89 = vector.shape_cast %86 : vector<2x16xf32> to vector<1x1x2x16xf32>
      tpu.vector_store %arg7[%c0_42, %c5_43, %c0_44, %c0_45], %89 {strides = array<i32>} : memref<1x8x2x16xf32, #tpu.memory_space<vmem>>, vector<1x1x2x16xf32>,
      %c0_46 = arith.constant 0 : index
      %c4 = arith.constant 4 : index
      %c0_47 = arith.constant 0 : index
      %c0_48 = arith.constant 0 : index
      %90 = vector.load %arg3[%c0_46, %c4, %c0_47, %c0_48] : memref<1x8x2x64xf32, #tpu.memory_space<vmem>>, vector<1x1x2x64xf32>
      %91 = vector.shape_cast %90 : vector<1x1x2x64xf32> to vector<2x64xf32>
      %cst_49 = arith.constant dense<0.000000e+00> : vector<2x64xf32>
      %92 = tpu.matmul %86, %4, %cst_49 {dimension_numbers = #tpu.dot_dimension_numbers<[1], [0], [0], [1], [0, 0, 1, 1], [], []>} : vector<2x16xf32>, vector<16x64xf32>, vector<2x64xf32> -> vector<2x64xf32>
      %93 = arith.addf %91, %92 : vector<2x64xf32>
      %94 = vector.extract_strided_slice %93 {offsets = [0, 0], sizes = [2, 48], strides = [1, 1]} : vector<2x64xf32> to vector<2x48xf32>
      %95 = arith.negf %94 : vector<2x48xf32>
      %96 = math.exp %95 : vector<2x48xf32>
      %cst_50 = arith.constant 1.000000e+00 : f32
      %97 = vector.broadcast %cst_50 : f32 to vector<2x48xf32>
      %98 = arith.addf %97, %96 : vector<2x48xf32>
      %99 = arith.divf %97, %98 : vector<2x48xf32>
      %100 = vector.extract_strided_slice %93 {offsets = [0, 48], sizes = [2, 16], strides = [1, 1]} : vector<2x64xf32> to vector<2x16xf32>
      %101 = math.tanh %100 : vector<2x16xf32>
      %102 = vector.extract_strided_slice %99 {offsets = [0, 16], sizes = [2, 16], strides = [1, 1]} : vector<2x48xf32> to vector<2x16xf32>
      %103 = arith.mulf %102, %83 : vector<2x16xf32>
      %104 = vector.extract_strided_slice %99 {offsets = [0, 0], sizes = [2, 16], strides = [1, 1]} : vector<2x48xf32> to vector<2x16xf32>
      %105 = arith.mulf %104, %101 : vector<2x16xf32>
      %106 = arith.addf %103, %105 : vector<2x16xf32>
      %107 = vector.extract_strided_slice %99 {offsets = [0, 32], sizes = [2, 16], strides = [1, 1]} : vector<2x48xf32> to vector<2x16xf32>
      %108 = math.tanh %106 : vector<2x16xf32>
      %109 = arith.mulf %107, %108 : vector<2x16xf32>
      %c0_51 = arith.constant 0 : index
      %c4_52 = arith.constant 4 : index
      %c0_53 = arith.constant 0 : index
      %c0_54 = arith.constant 0 : index
      %110 = vector.load %arg7[%c0_51, %c4_52, %c0_53, %c0_54] : memref<1x8x2x16xf32, #tpu.memory_space<vmem>>, vector<1x1x2x16xf32>
      %111 = vector.shape_cast %110 : vector<1x1x2x16xf32> to vector<2x16xf32>
      %112 = vector.shape_cast %109 : vector<2x16xf32> to vector<1x1x2x16xf32>
      tpu.vector_store %arg7[%c0_51, %c4_52, %c0_53, %c0_54], %112 {strides = array<i32>} : memref<1x8x2x16xf32, #tpu.memory_space<vmem>>, vector<1x1x2x16xf32>,
      %c0_55 = arith.constant 0 : index
      %c3 = arith.constant 3 : index
      %c0_56 = arith.constant 0 : index
      %c0_57 = arith.constant 0 : index
      %113 = vector.load %arg3[%c0_55, %c3, %c0_56, %c0_57] : memref<1x8x2x64xf32, #tpu.memory_space<vmem>>, vector<1x1x2x64xf32>
      %114 = vector.shape_cast %113 : vector<1x1x2x64xf32> to vector<2x64xf32>
      %cst_58 = arith.constant dense<0.000000e+00> : vector<2x64xf32>
      %115 = tpu.matmul %109, %4, %cst_58 {dimension_numbers = #tpu.dot_dimension_numbers<[1], [0], [0], [1], [0, 0, 1, 1], [], []>} : vector<2x16xf32>, vector<16x64xf32>, vector<2x64xf32> -> vector<2x64xf32>
      %116 = arith.addf %114, %115 : vector<2x64xf32>
      %117 = vector.extract_strided_slice %116 {offsets = [0, 0], sizes = [2, 48], strides = [1, 1]} : vector<2x64xf32> to vector<2x48xf32>
      %118 = arith.negf %117 : vector<2x48xf32>
      %119 = math.exp %118 : vector<2x48xf32>
      %cst_59 = arith.constant 1.000000e+00 : f32
      %120 = vector.broadcast %cst_59 : f32 to vector<2x48xf32>
      %121 = arith.addf %120, %119 : vector<2x48xf32>
      %122 = arith.divf %120, %121 : vector<2x48xf32>
      %123 = vector.extract_strided_slice %116 {offsets = [0, 48], sizes = [2, 16], strides = [1, 1]} : vector<2x64xf32> to vector<2x16xf32>
      %124 = math.tanh %123 : vector<2x16xf32>
      %125 = vector.extract_strided_slice %122 {offsets = [0, 16], sizes = [2, 16], strides = [1, 1]} : vector<2x48xf32> to vector<2x16xf32>
      %126 = arith.mulf %125, %106 : vector<2x16xf32>
      %127 = vector.extract_strided_slice %122 {offsets = [0, 0], sizes = [2, 16], strides = [1, 1]} : vector<2x48xf32> to vector<2x16xf32>
      %128 = arith.mulf %127, %124 : vector<2x16xf32>
      %129 = arith.addf %126, %128 : vector<2x16xf32>
      %130 = vector.extract_strided_slice %122 {offsets = [0, 32], sizes = [2, 16], strides = [1, 1]} : vector<2x48xf32> to vector<2x16xf32>
      %131 = math.tanh %129 : vector<2x16xf32>
      %132 = arith.mulf %130, %131 : vector<2x16xf32>
      %c0_60 = arith.constant 0 : index
      %c3_61 = arith.constant 3 : index
      %c0_62 = arith.constant 0 : index
      %c0_63 = arith.constant 0 : index
      %133 = vector.load %arg7[%c0_60, %c3_61, %c0_62, %c0_63] : memref<1x8x2x16xf32, #tpu.memory_space<vmem>>, vector<1x1x2x16xf32>
      %134 = vector.shape_cast %133 : vector<1x1x2x16xf32> to vector<2x16xf32>
      %135 = vector.shape_cast %132 : vector<2x16xf32> to vector<1x1x2x16xf32>
      tpu.vector_store %arg7[%c0_60, %c3_61, %c0_62, %c0_63], %135 {strides = array<i32>} : memref<1x8x2x16xf32, #tpu.memory_space<vmem>>, vector<1x1x2x16xf32>,
      %c0_64 = arith.constant 0 : index
      %c2 = arith.constant 2 : index
      %c0_65 = arith.constant 0 : index
      %c0_66 = arith.constant 0 : index
      %136 = vector.load %arg3[%c0_64, %c2, %c0_65, %c0_66] : memref<1x8x2x64xf32, #tpu.memory_space<vmem>>, vector<1x1x2x64xf32>
      %137 = vector.shape_cast %136 : vector<1x1x2x64xf32> to vector<2x64xf32>
      %cst_67 = arith.constant dense<0.000000e+00> : vector<2x64xf32>
      %138 = tpu.matmul %132, %4, %cst_67 {dimension_numbers = #tpu.dot_dimension_numbers<[1], [0], [0], [1], [0, 0, 1, 1], [], []>} : vector<2x16xf32>, vector<16x64xf32>, vector<2x64xf32> -> vector<2x64xf32>
      %139 = arith.addf %137, %138 : vector<2x64xf32>
      %140 = vector.extract_strided_slice %139 {offsets = [0, 0], sizes = [2, 48], strides = [1, 1]} : vector<2x64xf32> to vector<2x48xf32>
      %141 = arith.negf %140 : vector<2x48xf32>
      %142 = math.exp %141 : vector<2x48xf32>
      %cst_68 = arith.constant 1.000000e+00 : f32
      %143 = vector.broadcast %cst_68 : f32 to vector<2x48xf32>
      %144 = arith.addf %143, %142 : vector<2x48xf32>
      %145 = arith.divf %143, %144 : vector<2x48xf32>
      %146 = vector.extract_strided_slice %139 {offsets = [0, 48], sizes = [2, 16], strides = [1, 1]} : vector<2x64xf32> to vector<2x16xf32>
      %147 = math.tanh %146 : vector<2x16xf32>
      %148 = vector.extract_strided_slice %145 {offsets = [0, 16], sizes = [2, 16], strides = [1, 1]} : vector<2x48xf32> to vector<2x16xf32>
      %149 = arith.mulf %148, %129 : vector<2x16xf32>
      %150 = vector.extract_strided_slice %145 {offsets = [0, 0], sizes = [2, 16], strides = [1, 1]} : vector<2x48xf32> to vector<2x16xf32>
      %151 = arith.mulf %150, %147 : vector<2x16xf32>
      %152 = arith.addf %149, %151 : vector<2x16xf32>
      %153 = vector.extract_strided_slice %145 {offsets = [0, 32], sizes = [2, 16], strides = [1, 1]} : vector<2x48xf32> to vector<2x16xf32>
      %154 = math.tanh %152 : vector<2x16xf32>
      %155 = arith.mulf %153, %154 : vector<2x16xf32>
      %c0_69 = arith.constant 0 : index
      %c2_70 = arith.constant 2 : index
      %c0_71 = arith.constant 0 : index
      %c0_72 = arith.constant 0 : index
      %156 = vector.load %arg7[%c0_69, %c2_70, %c0_71, %c0_72] : memref<1x8x2x16xf32, #tpu.memory_space<vmem>>, vector<1x1x2x16xf32>
      %157 = vector.shape_cast %156 : vector<1x1x2x16xf32> to vector<2x16xf32>
      %158 = vector.shape_cast %155 : vector<2x16xf32> to vector<1x1x2x16xf32>
      tpu.vector_store %arg7[%c0_69, %c2_70, %c0_71, %c0_72], %158 {strides = array<i32>} : memref<1x8x2x16xf32, #tpu.memory_space<vmem>>, vector<1x1x2x16xf32>,
      %c0_73 = arith.constant 0 : index
      %c1 = arith.constant 1 : index
      %c0_74 = arith.constant 0 : index
      %c0_75 = arith.constant 0 : index
      %159 = vector.load %arg3[%c0_73, %c1, %c0_74, %c0_75] : memref<1x8x2x64xf32, #tpu.memory_space<vmem>>, vector<1x1x2x64xf32>
      %160 = vector.shape_cast %159 : vector<1x1x2x64xf32> to vector<2x64xf32>
      %cst_76 = arith.constant dense<0.000000e+00> : vector<2x64xf32>
      %161 = tpu.matmul %155, %4, %cst_76 {dimension_numbers = #tpu.dot_dimension_numbers<[1], [0], [0], [1], [0, 0, 1, 1], [], []>} : vector<2x16xf32>, vector<16x64xf32>, vector<2x64xf32> -> vector<2x64xf32>
      %162 = arith.addf %160, %161 : vector<2x64xf32>
      %163 = vector.extract_strided_slice %162 {offsets = [0, 0], sizes = [2, 48], strides = [1, 1]} : vector<2x64xf32> to vector<2x48xf32>
      %164 = arith.negf %163 : vector<2x48xf32>
      %165 = math.exp %164 : vector<2x48xf32>
      %cst_77 = arith.constant 1.000000e+00 : f32
      %166 = vector.broadcast %cst_77 : f32 to vector<2x48xf32>
      %167 = arith.addf %166, %165 : vector<2x48xf32>
      %168 = arith.divf %166, %167 : vector<2x48xf32>
      %169 = vector.extract_strided_slice %162 {offsets = [0, 48], sizes = [2, 16], strides = [1, 1]} : vector<2x64xf32> to vector<2x16xf32>
      %170 = math.tanh %169 : vector<2x16xf32>
      %171 = vector.extract_strided_slice %168 {offsets = [0, 16], sizes = [2, 16], strides = [1, 1]} : vector<2x48xf32> to vector<2x16xf32>
      %172 = arith.mulf %171, %152 : vector<2x16xf32>
      %173 = vector.extract_strided_slice %168 {offsets = [0, 0], sizes = [2, 16], strides = [1, 1]} : vector<2x48xf32> to vector<2x16xf32>
      %174 = arith.mulf %173, %170 : vector<2x16xf32>
      %175 = arith.addf %172, %174 : vector<2x16xf32>
      %176 = vector.extract_strided_slice %168 {offsets = [0, 32], sizes = [2, 16], strides = [1, 1]} : vector<2x48xf32> to vector<2x16xf32>
      %177 = math.tanh %175 : vector<2x16xf32>
      %178 = arith.mulf %176, %177 : vector<2x16xf32>
      %c0_78 = arith.constant 0 : index
      %c1_79 = arith.constant 1 : index
      %c0_80 = arith.constant 0 : index
      %c0_81 = arith.constant 0 : index
      %179 = vector.load %arg7[%c0_78, %c1_79, %c0_80, %c0_81] : memref<1x8x2x16xf32, #tpu.memory_space<vmem>>, vector<1x1x2x16xf32>
      %180 = vector.shape_cast %179 : vector<1x1x2x16xf32> to vector<2x16xf32>
      %181 = vector.shape_cast %178 : vector<2x16xf32> to vector<1x1x2x16xf32>
      tpu.vector_store %arg7[%c0_78, %c1_79, %c0_80, %c0_81], %181 {strides = array<i32>} : memref<1x8x2x16xf32, #tpu.memory_space<vmem>>, vector<1x1x2x16xf32>,
      %c0_82 = arith.constant 0 : index
      %c0_83 = arith.constant 0 : index
      %c0_84 = arith.constant 0 : index
      %c0_85 = arith.constant 0 : index
      %182 = vector.load %arg3[%c0_82, %c0_83, %c0_84, %c0_85] : memref<1x8x2x64xf32, #tpu.memory_space<vmem>>, vector<1x1x2x64xf32>
      %183 = vector.shape_cast %182 : vector<1x1x2x64xf32> to vector<2x64xf32>
      %cst_86 = arith.constant dense<0.000000e+00> : vector<2x64xf32>
      %184 = tpu.matmul %178, %4, %cst_86 {dimension_numbers = #tpu.dot_dimension_numbers<[1], [0], [0], [1], [0, 0, 1, 1], [], []>} : vector<2x16xf32>, vector<16x64xf32>, vector<2x64xf32> -> vector<2x64xf32>
      %185 = arith.addf %183, %184 : vector<2x64xf32>
      %186 = vector.extract_strided_slice %185 {offsets = [0, 0], sizes = [2, 48], strides = [1, 1]} : vector<2x64xf32> to vector<2x48xf32>
      %187 = arith.negf %186 : vector<2x48xf32>
      %188 = math.exp %187 : vector<2x48xf32>
      %cst_87 = arith.constant 1.000000e+00 : f32
      %189 = vector.broadcast %cst_87 : f32 to vector<2x48xf32>
      %190 = arith.addf %189, %188 : vector<2x48xf32>
      %191 = arith.divf %189, %190 : vector<2x48xf32>
      %192 = vector.extract_strided_slice %185 {offsets = [0, 48], sizes = [2, 16], strides = [1, 1]} : vector<2x64xf32> to vector<2x16xf32>
      %193 = math.tanh %192 : vector<2x16xf32>
      %194 = vector.extract_strided_slice %191 {offsets = [0, 16], sizes = [2, 16], strides = [1, 1]} : vector<2x48xf32> to vector<2x16xf32>
      %195 = arith.mulf %194, %175 : vector<2x16xf32>
      %196 = vector.extract_strided_slice %191 {offsets = [0, 0], sizes = [2, 16], strides = [1, 1]} : vector<2x48xf32> to vector<2x16xf32>
      %197 = arith.mulf %196, %193 : vector<2x16xf32>
      %198 = arith.addf %195, %197 : vector<2x16xf32>
      %199 = vector.extract_strided_slice %191 {offsets = [0, 32], sizes = [2, 16], strides = [1, 1]} : vector<2x48xf32> to vector<2x16xf32>
      %200 = math.tanh %198 : vector<2x16xf32>
      %201 = arith.mulf %199, %200 : vector<2x16xf32>
      %c0_88 = arith.constant 0 : index
      %c0_89 = arith.constant 0 : index
      %c0_90 = arith.constant 0 : index
      %c0_91 = arith.constant 0 : index
      %202 = vector.load %arg7[%c0_88, %c0_89, %c0_90, %c0_91] : memref<1x8x2x16xf32, #tpu.memory_space<vmem>>, vector<1x1x2x16xf32>
      %203 = vector.shape_cast %202 : vector<1x1x2x16xf32> to vector<2x16xf32>
      %204 = vector.shape_cast %201 : vector<2x16xf32> to vector<1x1x2x16xf32>
      tpu.vector_store %arg7[%c0_88, %c0_89, %c0_90, %c0_91], %204 {strides = array<i32>} : memref<1x8x2x16xf32, #tpu.memory_space<vmem>>, vector<1x1x2x16xf32>,
      %c0_92 = arith.constant 0 : index
      %c0_93 = arith.constant 0 : index
      %205 = vector.load %arg10[%c0_92, %c0_93] : memref<2x16xf32, #tpu.memory_space<vmem>>, vector<2x16xf32>
      tpu.vector_store %arg10[%c0_92, %c0_93], %201 {strides = array<i32>} : memref<2x16xf32, #tpu.memory_space<vmem>>, vector<2x16xf32>,
      %c0_94 = arith.constant 0 : index
      %c0_95 = arith.constant 0 : index
      %206 = vector.load %arg11[%c0_94, %c0_95] : memref<2x16xf32, #tpu.memory_space<vmem>>, vector<2x16xf32>
      tpu.vector_store %arg11[%c0_94, %c0_95], %198 {strides = array<i32>} : memref<2x16xf32, #tpu.memory_space<vmem>>, vector<2x16xf32>,
    } else {
    }
    %c0_6 = arith.constant 0 : index
    %c0_7 = arith.constant 0 : index
    %11 = vector.load %arg10[%c0_6, %c0_7] : memref<2x16xf32, #tpu.memory_space<vmem>>, vector<2x16xf32>
    %c0_8 = arith.constant 0 : index
    %c0_9 = arith.constant 0 : index
    %c0_10 = arith.constant 0 : index
    %12 = vector.load %arg8[%c0_8, %c0_9, %c0_10] : memref<1x2x16xf32, #tpu.memory_space<vmem>>, vector<1x2x16xf32>
    %13 = vector.shape_cast %12 : vector<1x2x16xf32> to vector<2x16xf32>
    %14 = vector.shape_cast %11 : vector<2x16xf32> to vector<1x2x16xf32>
    tpu.vector_store %arg8[%c0_8, %c0_9, %c0_10], %14 {strides = array<i32>} : memref<1x2x16xf32, #tpu.memory_space<vmem>>, vector<1x2x16xf32>,
    %c0_11 = arith.constant 0 : index
    %c0_12 = arith.constant 0 : index
    %15 = vector.load %arg11[%c0_11, %c0_12] : memref<2x16xf32, #tpu.memory_space<vmem>>, vector<2x16xf32>
    %c0_13 = arith.constant 0 : index
    %c0_14 = arith.constant 0 : index
    %c0_15 = arith.constant 0 : index
    %16 = vector.load %arg9[%c0_13, %c0_14, %c0_15] : memref<1x2x16xf32, #tpu.memory_space<vmem>>, vector<1x2x16xf32>
    %17 = vector.shape_cast %16 : vector<1x2x16xf32> to vector<2x16xf32>
    %18 = vector.shape_cast %15 : vector<2x16xf32> to vector<1x2x16xf32>
    tpu.vector_store %arg9[%c0_13, %c0_14, %c0_15], %18 {strides = array<i32>} : memref<1x2x16xf32, #tpu.memory_space<vmem>>, vector<1x2x16xf32>,
    return
  }
  func.func @transform_0(%arg0: i32, %arg1: i32, %arg2: i32) -> (i32, i32, i32, i32) {
    %c0_i32 = arith.constant 0 : i32
    %0 = arith.cmpi eq, %arg0, %c0_i32 : i32
    %c0_i32_0 = arith.constant 0 : i32
    %1 = arith.subi %c0_i32_0, %arg2 : i32
    %2 = arith.select %0, %arg2, %1 : i32
    %c0_i32_1 = arith.constant 0 : i32
    %c0_i32_2 = arith.constant 0 : i32
    return %arg0, %2, %arg1, %c0_i32_1 : i32, i32, i32, i32
  }
  func.func @transform_1(%arg0: i32, %arg1: i32, %arg2: i32) -> (i32, i32, i32) {
    %c0_i32 = arith.constant 0 : i32
    %c0_i32_0 = arith.constant 0 : i32
    %c0_i32_1 = arith.constant 0 : i32
    return %arg0, %c0_i32, %c0_i32_0 : i32, i32, i32
  }
  func.func @transform_2(%arg0: i32, %arg1: i32, %arg2: i32) -> (i32, i32, i32) {
    %c0_i32 = arith.constant 0 : i32
    %c0_i32_0 = arith.constant 0 : i32
    return %arg0, %arg1, %c0_i32 : i32, i32, i32
  }
  func.func @transform_3(%arg0: i32, %arg1: i32, %arg2: i32) -> (i32, i32, i32) {
    %c0_i32 = arith.constant 0 : i32
    %c0_i32_0 = arith.constant 0 : i32
    return %arg0, %arg1, %c0_i32 : i32, i32, i32
  }
  func.func @transform_4(%arg0: i32, %arg1: i32, %arg2: i32) -> (i32, i32, i32, i32) {
    %c0_i32 = arith.constant 0 : i32
    %0 = arith.cmpi eq, %arg0, %c0_i32 : i32
    %c0_i32_0 = arith.constant 0 : i32
    %1 = arith.subi %c0_i32_0, %arg2 : i32
    %2 = arith.select %0, %arg2, %1 : i32
    %c0_i32_1 = arith.constant 0 : i32
    %c0_i32_2 = arith.constant 0 : i32
    return %arg0, %2, %arg1, %c0_i32_1 : i32, i32, i32, i32
  }
  func.func @transform_5(%arg0: i32, %arg1: i32, %arg2: i32) -> (i32, i32, i32) {
    %c0_i32 = arith.constant 0 : i32
    %c0_i32_0 = arith.constant 0 : i32
    return %arg0, %arg1, %c0_i32 : i32, i32, i32
  }
  func.func @transform_6(%arg0: i32, %arg1: i32, %arg2: i32) -> (i32, i32, i32) {
    %c0_i32 = arith.constant 0 : i32
    %c0_i32_0 = arith.constant 0 : i32
    return %arg0, %arg1, %c0_i32 : i32, i32, i32
  }
}

</mosaic_0001>

<bundles_post_ra>
// kernel: tpu_custom_call.1
= control target key start
LH: loop header
LB: loop body
LE: loop exit
PB: predicated region body
PF: predicated region fallthrough
CT: control target
= control target key end

     0   :  { %s3756_s0 = inlined_call_operand.hbm [shape: f32[2,8,2,64], index: 0, kind: input, shape index: {}]   ;;  %s3757_s1 = inlined_call_operand.hbm [shape: f32[2,16,64], index: 1, kind: input, shape index: {}]   ;;  %s3758_s2 = inlined_call_operand.vmem [shape: f32[2,2,16], index: 2, kind: input, shape index: {}]   ;;  %s3759_s3 = inlined_call_operand.vmem [shape: f32[2,2,16], index: 3, kind: input, shape index: {}]   ;;  %s3760_s4 = inlined_call_operand.hbm [shape: f32[2,8,2,16], index: 4, kind: output, shape index: {0}]   ;;  %s3761_s5 = inlined_call_operand.hbm [shape: f32[2,2,16], index: 5, kind: output, shape index: {1}]   ;;  %s3762_s6 = inlined_call_operand.hbm [shape: f32[2,2,16], index: 6, kind: output, shape index: {2}]  }
   0x1   :  { %3769 = sst [smem:[#allocation19_spill]] %s3756_s0 }
   0x2   :  { %12 = vsyncpa [#allocation5], 0 }
   0x3   :  { %14 = vsyncpa [#allocation5 + $0x1], 0 }
   0x4   :  { %15 = vsyncpa [#allocation8], 0 }
   0x5   :  { %17 = vsyncpa [#allocation8 + $0x1], 0 }
   0x6   :  { %18 = vsyncpa [#allocation6], 0 }
   0x7   :  { %20 = vsyncpa [#allocation6 + $0x1], 0 }
   0x8   :  { %21 = vsyncpa [#allocation11], 0 }
   0x9   :  { %23 = vsyncpa [#allocation11 + $0x1], 0  ;;  %s3230_s21 = smov 0   ;;  %s3232_s22 = smov 0  }
   0xa   :  { %s3234_s23 = smov 0   ;;  %s3236_s24 = smov 0  }
   0xb   :  { %s3238_s25 = smov 0   ;;  %s3240_s26 = smov 0  }
   0xc LB: > { %s3261_s27 = sadd.s32 4294967295, %s3168_s26   ;;  %s3763_s28 = sadd.s32 4294967294, %s3168_s26   ;;  %s3168_s26 = sphi %s3240_s26, %s29_s26   ;;  %s3164_s25 = sphi %s3238_s25, %s3793_s25   ;;  %s3160_s24 = sphi %s3236_s24, %s3792_s24   ;;  %s3156_s23 = sphi %s3234_s23, %s3791_s23   ;;  %s3152_s22 = sphi %s3232_s22, %s3790_s22   ;;  %s3148_s21 = sphi %s3230_s21, %s3789_s21  }
   0xd   : > { %s48_s29 = sadd.s32 1, %s3164_s25  ;;  %s65_s30 = sadd.s32 1, %s3156_s23 }
   0xe   : > { %p50_p0 = scmp.ge.s32.totalorder %s48_s29, 2  ;;  %p72_p1 = scmp.ne.s32.totalorder %s3156_s23, %s3152_s22 }
   0xf   : > { %p73_p2 = scmp.eq.s32.totalorder %s3168_s26, 0  ;;  %p78_p3 = scmp.ne.s32.totalorder %s3152_s22, %s3148_s21 }
  0x10   : > { %s3795_s29 = smov (%p50_p0, %s48_s29), 0  ;;  %p79_p5 = scmp.eq.s32.totalorder %s3261_s27, 0 }
  0x11   : > { %3770 = sst [smem:[#allocation17_spill]] %s3795_s29  ;;  %p3273_p4 = por %p73_p2, %p72_p1 }
  0x12   : > { %s58_s8 = ssub.s32 %s3164_s25, %s3795_s29  ;;  %p194_p6 = scmp.eq.s32.totalorder %s3261_s27, 1 }
  0x13   : > { %p63_p7 = scmp.eq.s32.totalorder %s58_s8, 0  ;;  %p3281_p8 = por %p79_p5, %p78_p3 }
  0x14   : > { %p3285_p9 = por %p194_p6, %p72_p1  ;;  %p200_p10 = scmp.eq.s32.totalorder %s3763_s28, 1 }
  0x15   : > { %s3772_s9 = scalar_select %p3281_p8, 1, 0 }
  0x16   : > { %s3773_s10 = scalar_select %p3285_p9, 1, 0 }
  0x17   : > { %s3292_s11 = scalar_select %p63_p7, %s3156_s23, %s65_s30  }
  0x18   : > { %p3294_p11 = por %p200_p10, %p78_p3  ;;  %p2764_p13 = scmp.lt.s32.totalorder %s3168_s26, 2 }
  0x19   : > { %3774 = sst [smem:[#allocation18_spill]] %s3292_s11  ;;  %s3301_s13 = sand.u32 1, %s3156_s23  }
  0x1a   : > { %s3775_s12 = scalar_select %p3294_p11, 1, 0 }
  0x1b   : > { %s3764_s14 = sshll.u32 %s3301_s13, 4  ;;  %s3765_s15 = sshll.u32 %s3164_s25, 8 }
  0x1c   : > { %s3776_s0 = sld [smem:[#allocation19_spill]]  ;;  %s280_s19 = scalar_lea.vmem [#allocation4], %s3764_s14 }
  0x1d   : > { %s293_s20 = sshll.u32 %s280_s19, 4  ;;  %p3318_p0 = pnand %p2764_p13, %p3273_p4  ;;  %s3314_s20 = int_to_ptr.vmem [resolvable:$true] %s293_s20 }
  0x1e   : > { %s277_s8 = scalar_lea.sflag [#allocation5], %s3301_s13 }
  0x1f   : > { %p2964_p3 = pneg %p3318_p0 }
  0x22   : > { %s3310_s18 = scalar_lea.hbm %s3776_s0, %s3765_s15  ;;  %s2967_s7 = scalar_lea.hbm %s3776_s0, 512 }
  0x23   : > { %s2962_s16 = scalar_lea.hbm %s3310_s18, 256  ;;  %p2968_p4 = scmp.lt.u32.totalorder %s3310_s18, %s3776_s0 }
  0x24   : > { %p2963_p2 = scmp.ne.s32.totalorder %s3310_s18, %s2962_s16  ;;  %p2969_p7 = scmp.lt.u32.totalorder %s2967_s7, %s2962_s16 }
  0x25   : > { %p2971_p13 = scmp.lt.u32.totalorder %s2962_s16, %s3310_s18 }
  0x26   : > { %p2965_p5 = pnand %p2964_p3, %p2963_p2  ;;  %p2970_p10 = por %p2969_p7, %p2968_p4 }
  0x28   : > { %p2966_p6 = pneg %p2965_p5  ;;  %p2972_p12 = por %p2971_p13, %p2970_p10 }
  0x2a   : > { %p2973_p1 = pnand %p2972_p12, %p2966_p6 }
  0x2c   : > { %2976 = shalt.err (!%p2973_p1)
}
  0x2d   : > { %s2977_s15 = scalar_lea.vmem %s3314_s20, 256  ;;  %s3170_s17 = smov [#allocation4]  }
  0x2e   : > { %p2978_p2 = scmp.ne.s32.totalorder %s3314_s20, %s2977_s15  ;;  %s2982_s19 = sshll.u32 %s3170_s17, 4  ;;  %s2983_s19 = int_to_ptr.vmem [resolvable:$false] %s2982_s19 }
  0x2f   : > { %s2984_s28 = scalar_lea.vmem %s2983_s19, 512  ;;  %p2985_p9 = scmp.lt.s32.totalorder %s3314_s20, %s2983_s19 }
  0x30   : > { %p2980_p5 = pnand %p2978_p2, %p2964_p3  ;;  %p2986_p4 = scmp.lt.s32.totalorder %s2984_s28, %s2977_s15 }
  0x32   : > { %p2981_p11 = pneg %p2980_p5  ;;  %p2987_p7 = por %p2986_p4, %p2985_p9 }
  0x34   : > { %p2988_p10 = pnand %p2987_p7, %p2981_p11 }
  0x36   : > { %2991 = shalt.err (!%p2988_p10)
}
  0x37   : > { %s3171_s14 = smov 32   ;;  %s3172_s16 = smov 2  }
  0x38   : > { %2750 = dma.hbm_to_vmem [thread:$0]  (!%p3318_p0), %s3310_s18, 256, %s3314_s20, %s277_s8, %s3171_s14, %s3171_s14, %s3172_s16  }
  0x39   : > { %p342_p12 = scmp.lt.s32.totalorder %s3168_s26, 3  ;;  %s3778_s15 = sshll.u32 %s3164_s25, 8 }
  0x3a   : > { %s3357_s19 = scalar_lea.hbm %s3757_s1, %s3778_s15  ;;  %p3779_p9 = scmp.ge.s32.totalorder %s3168_s26, 1 }
  0x3b   : > { %s3781_s0 = sshll.u32 %s3301_s13, 4  ;;  %s304_s18 = scalar_lea.sflag [#allocation8], %s3301_s13 }
  0x3c   : > { %p3361_p11 = pnand %p3779_p9, %p342_p12  ;;  %s307_s29 = scalar_lea.vmem [#allocation7], %s3781_s0 }
  0x3d   : > { %s314_s11 = sshll.u32 %s307_s29, 4  ;;  %s2992_s20 = scalar_lea.hbm %s3357_s19, 256  ;;  %s3367_s11 = int_to_ptr.vmem [resolvable:$true] %s314_s11 }
  0x3e   : > { %p2993_p1 = scmp.ne.s32.totalorder %s3357_s19, %s2992_s20  ;;  %s2997_s16 = scalar_lea.hbm %s3757_s1, 512 }
  0x3f   : > { %p2998_p2 = scmp.lt.u32.totalorder %s3357_s19, %s3757_s1  ;;  %p2999_p5 = scmp.lt.u32.totalorder %s2997_s16, %s2992_s20 }
  0x40   : > { %p2995_p6 = pnand %p2993_p1, %p2964_p3  ;;  %p3001_p7 = scmp.lt.u32.totalorder %s2992_s20, %s3357_s19 }
  0x41   : > { %p3000_p4 = por %p2999_p5, %p2998_p2 }
  0x42   : > { %p2996_p13 = pneg %p2995_p6 }
  0x43   : > { %p3002_p10 = por %p3001_p7, %p3000_p4 }
  0x45   : > { %p3003_p12 = pnand %p3002_p10, %p2996_p13 }
  0x47   : > { %3006 = shalt.err (!%p3003_p12)
}
  0x48   : > { %s3007_s0 = scalar_lea.vmem %s3367_s11, 256  ;;  %s3173_s29 = smov [#allocation7]  }
  0x49   : > { %p3008_p9 = scmp.ne.s32.totalorder %s3367_s11, %s3007_s0  ;;  %s3012_s17 = sshll.u32 %s3173_s29, 4  ;;  %s3013_s17 = int_to_ptr.vmem [resolvable:$false] %s3012_s17 }
  0x4a   : > { %s3014_s8 = scalar_lea.vmem %s3013_s17, 512  ;;  %p3015_p8 = scmp.lt.s32.totalorder %s3367_s11, %s3013_s17 }
  0x4b   : > { %p3010_p1 = pnand %p3008_p9, %p2964_p3  ;;  %p3016_p2 = scmp.lt.s32.totalorder %s3014_s8, %s3007_s0 }
  0x4d   : > { %p3011_p6 = pneg %p3010_p1  ;;  %p3017_p5 = por %p3016_p2, %p3015_p8 }
  0x4f   : > { %p3018_p4 = pnand %p3017_p5, %p3011_p6 }
  0x51   : > { %3021 = shalt.err (!%p3018_p4)
}
  0x52   : > { %s3174_s20 = smov 128   ;;  %s3175_s14 = smov 8  }
  0x53   : > { %2753 = dma.hbm_to_vmem [thread:$0]  (!%p3318_p0), %s3357_s19, 256, %s3367_s11, %s304_s18, %s3174_s20, %s3174_s20, %s3175_s14  }
  0x54   : > { %346 = sbr.rel (%p3361_p11) target bundleno = 11424 (0x2ca0), region = 36  ;;  %s3398_s16 = sand.u32 (!%p3361_p11), 1, %s3152_s22  }
  0x55   : > { %s2448_s15 = sshll.u32 (!%p3361_p11), %s3398_s16, 4  ;;  %s349_s7 = scalar_lea.sflag (!%p3361_p11), [#allocation5], %s3398_s16 }
  0x56   : > { %s3402_s0 = scalar_lea.vmem (!%p3361_p11), [#allocation4], %s2448_s15  ;;  %p3782_p8 = scmp.ne.s32.totalorder (!%p3361_p11), %s3772_s9, 0 }
  0x5b   : > { %3131 = dma.done.wait (%p3782_p8), %s349_s7, 256  }
  0x5c   : > { %3133 = vsyncadd (%p3782_p8), %s349_s7, 4294967040  ;;  %s358_s11 = scalar_lea.sflag [#allocation8], %s3398_s16  ;;  %s361_s13 = scalar_lea.vmem [#allocation7], %s2448_s15 }
  0x5d   : > { %3135 = dma.done.wait (%p3782_p8), %s358_s11, 256  }
  0x5e   : > { %3137 = vsyncadd (%p3782_p8), %s358_s11, 4294967040  ;;  %s2451_s30 = sshll.u32 %s3398_s16, 1  ;;  %p423_p0 = scmp.lt.s32.totalorder %s3160_s24, 1  ;;  %vm446_vm0 = vcmask 123904   ;;  %v3416_v0 = vld [vmem:[%s361_s13] sm:$0xff]  ;;  %v3418_v1 = vld [vmem:[%s361_s13 + $0x8] sm:$0xff] }
  0x5f   : > { %s3428_s14 = scalar_lea.vmem [#allocation9], %s2448_s15  ;;  %s3430_s7 = scalar_lea.vmem [#allocation10], %s2451_s30 }
  0x60   : > { %s424_s19 = scalar_select %p423_p0, %s3160_s24, 1 }
  0x61   : > { %s3432_s11 = scalar_lea.vmem [#allocation12], %s2451_s30  ;;  %p2455_p3 = scmp.ne.s32.totalorder %s3160_s24, 0 }
  0x62   : > { %s2453_s28 = sshll.u32 %s424_s19, 1  ;;  %v3437_v4 = vpack.c.bf16 (!%p2455_p3), %v3418_v1, %v3416_v0  ;;  %v3176_v5 = vmov (!%p2455_p3), 0.0|0.0   ;;  %vm3177_vm1 = vmmov (!%p2455_p3), 0   ;;  %v3178_v6 = vmov (!%p2455_p3), 0.0   ;;  %v458_v8 = vld [vmem:[%s3402_s0] sm:$0x3] (!%p2455_p3) }
  0x63   : > { %s429_s17 = scalar_lea.vmem %s3758_s2, %s2453_s28  ;;  %s436_s9 = scalar_lea.vmem %s3759_s3, %s2453_s28  ;;  %2689 = vmatprep.subr.bf16.mxu0 (!%p2455_p3), %v3176_v5  ;;  %2581 = vmatprep.mubr.msk.f32.mxu0 (!%p2455_p3), %vm3177_vm1, %v3178_v6  ;;  %vm459_vm2 = vcmask (!%p2455_p3), 130048   ;;  %v2458_v28 = vld [vmem:[%s3402_s0 + $0x2] sm:$0x3] (!%p2455_p3)  ;;  %v2462_v46 = vld [vmem:[%s3402_s0 + $0x4] sm:$0x3] (!%p2455_p3) }
  0x64   : > { %v445_v2 = vld [vmem:[%s429_s17] sm:$0x3]  ;;  %455 = sbr.rel (%p2455_p3) target bundleno = 5726 (0x165e), region = 52  ;;  %2691 = vmatpush3.bf16.msra.mxu0 (!%p2455_p3), %v3437_v4  ;;  %2692 = vmatprep.subr.bf16.mxu1 (!%p2455_p3), %v3176_v5  ;;  %s3179_s15 = smov (!%p2455_p3), 80  }
  0x65   : > { %v448_v3 = vld [vmem:[%s436_s9] sm:$0x3]  ;;  %447 = vst.msk [vmem:[#allocation2] sm:$0x3] %vm446_vm0, %v445_v2  ;;  %2694 = vmatpush3.bf16.msra.mxu1 (!%p2455_p3), %v3437_v4  ;;  %2588 = vmatprep.mubr.msk.f32.mxu1 (!%p2455_p3), %vm3177_vm1, %v3178_v6  ;;  %s3180_s13 = smov (!%p2455_p3), 16   ;;  %s3181_s30 = smov (!%p2455_p3), 96  }
  0x66   : > { %449 = vst.msk [vmem:[#allocation3] sm:$0x3] %vm446_vm0, %v448_v3  ;;  %2695 = vmatprep.subr.bf16.mxu0 (!%p2455_p3), %v3176_v5  ;;  %2698 = vmatprep.subr.bf16.mxu1 (!%p2455_p3), %v3176_v5  ;;  %v2466_v2 = vld [vmem:[%s3402_s0 + $0x6] sm:$0x3] (!%p2455_p3)  ;;  %s3182_s19 = smov (!%p2455_p3), 112  }
  0x6c   : > { %v456_v7 = vld [vmem:[#allocation2] sm:$0x3] }
  0x6d   : > { %2582 = vmatmul.mubr.msk.f32.vlgmr.msra.gmra.mrb[0].mxu0 %vm459_vm2, %v456_v7  ;;  %v457_v13 = vld [vmem:[#allocation3] sm:$0x3] }
  0x6e   : > { %2697 = vmatpush3.bf16.msra.mxu0 %v3437_v4  ;;  %2595 = vmatprep.mubr.msk.f32.mxu0 %vm3177_vm1, %v3178_v6 }
  0x6f   : > { %2701 = vmatprep.subr.bf16.mxu0 %v3176_v5 }
 0x140   : > { %v529_v9 = vpop.f32.mrb[0].mxu0 }
 0x141   : > { %v533_v10 = vadd.f32 %v529_v9, %v458_v8  ;;  %v2583_v11 = vpop.f32.mrb[1].mxu0 }
 0x143   : > { %2834 = vtanh.f32 %v533_v10  ;;  %v2457_v14 = vmul.f32 -1.442695, %v533_v10 }
 0x145   : > { %2836 = vpow2.f32 %v2457_v14 }
 0x14d   : > { %v2835_v12 = vpop.eup %2834 }
 0x14e   : > { %547 = vrot.lane.b32.xlu0 %v2835_v12, %s3179_s15 }
 0x14f   : > { %v2837_v15 = vpop.eup %2836 }
 0x150   : > { %v537_v16 = vadd.f32 1.0, %v2837_v15 }
 0x152   : > { %542 = vrot.lane.b32.xlu0 %v457_v13, %s3180_s13  ;;  %2838 = vrcp.f32 %v537_v16 }
 0x15c   : > { %v2839_v17 = vpop.eup %2838 }
 0x1c0   : > { %v548_v18 = vpop.permute.xlu0 %547 }
 0x1c1   : > { %v550_v19 = vmul.f32 %v2839_v17, %v548_v18 }
 0x1c3   : > { %552 = vrot.lane.b32.xlu1 %v550_v19, %s3180_s13 }
 0x1c4   : > { %v543_v20 = vpop.permute.xlu0 %542 }
 0x1c5   : > { %v545_v21 = vmul.f32 %v2839_v17, %v543_v20 }
 0x235   : > { %v553_v22 = vpop.permute.xlu1 %552 }
 0x236   : > { %v555_v23 = vadd.f32 %v553_v22, %v545_v21  ;;  %v2470_v22 = vld [vmem:[%s3402_s0 + $0x8] sm:$0x3] }
 0x238   : > { %2840 = vtanh.f32 %v555_v23 }
 0x242   : > { %v2841_v24 = vpop.eup %2840 }
 0x243   : > { %558 = vrot.lane.b32.xlu1 %v2841_v24, %s3180_s13 }
 0x2b5   : > { %v559_v25 = vpop.permute.xlu1 %558 }
 0x2b6   : > { %v561_v26 = vmul.f32 %v2839_v17, %v559_v25 }
 0x2b8   : > { %563 = vrot.lane.b32.xlu0 %v561_v26, %s3181_s30 }
 0x32a   : > { %v564_v27 = vpop.permute.xlu0 %563 }
 0x32b   : > { %567 = vst.msk [vmem:[%s3428_s14] sm:$0x3] %vm446_vm0, %v564_v27  ;;  %2589 = vmatmul.mubr.msk.f32.vlgmr.msra.gmra.mrb[0].mxu1 %vm459_vm2, %v564_v27 }
 0x32c   : > { %2700 = vmatpush3.bf16.msra.mxu1 %v3437_v4  ;;  %2602 = vmatprep.mubr.msk.f32.mxu1 %vm3177_vm1, %v3178_v6 }
 0x32d   : > { %2704 = vmatprep.subr.bf16.mxu1 %v3176_v5 }
 0x3fe   : > { %v638_v29 = vpop.f32.mrb[0].mxu1 }
 0x3ff   : > { %v642_v30 = vadd.f32 %v2458_v28, %v638_v29  ;;  %v2590_v31 = vpop.f32.mrb[1].mxu1 }
 0x401   : > { %2842 = vtanh.f32 %v642_v30  ;;  %v2460_v33 = vmul.f32 -1.442695, %v642_v30 }
 0x403   : > { %2844 = vpow2.f32 %v2460_v33 }
 0x40b   : > { %v2843_v32 = vpop.eup %2842 }
 0x40c   : > { %652 = vrot.lane.b32.xlu1 %v2843_v32, %s3179_s15 }
 0x40d   : > { %v2845_v34 = vpop.eup %2844 }
 0x40e   : > { %v646_v35 = vadd.f32 1.0, %v2845_v34 }
 0x410   : > { %2846 = vrcp.f32 %v646_v35 }
 0x41a   : > { %v2847_v36 = vpop.eup %2846 }
 0x41b   : > { %v650_v39 = vmul.f32 %v2847_v36, %v555_v23 }
 0x47e   : > { %v653_v37 = vpop.permute.xlu1 %652 }
 0x47f   : > { %v655_v38 = vmul.f32 %v2847_v36, %v653_v37 }
 0x481   : > { %657 = vrot.lane.b32.xlu0 %v655_v38, %s3180_s13 }
 0x4f3   : > { %v658_v40 = vpop.permute.xlu0 %657 }
 0x4f4   : > { %v660_v41 = vadd.f32 %v658_v40, %v650_v39  ;;  %v2474_v40 = vld [vmem:[%s3402_s0 + $0xa] sm:$0x3] }
 0x4f6   : > { %2848 = vtanh.f32 %v660_v41 }
 0x500   : > { %v2849_v42 = vpop.eup %2848 }
 0x501   : > { %663 = vrot.lane.b32.xlu1 %v2849_v42, %s3180_s13 }
 0x573   : > { %v664_v43 = vpop.permute.xlu1 %663 }
 0x574   : > { %v666_v44 = vmul.f32 %v2847_v36, %v664_v43 }
 0x576   : > { %668 = vrot.lane.b32.xlu0 %v666_v44, %s3181_s30 }
 0x5e8   : > { %v669_v45 = vpop.permute.xlu0 %668 }
 0x5e9   : > { %2461 = vst.msk [vmem:[%s3428_s14 + $0x2] sm:$0x3] %vm446_vm0, %v669_v45  ;;  %2596 = vmatmul.mubr.msk.f32.vlgmr.msra.gmra.mrb[2].mxu0 %vm459_vm2, %v669_v45 }
 0x5ea   : > { %2703 = vmatpush3.bf16.msra.mxu0 %v3437_v4  ;;  %2609 = vmatprep.mubr.msk.f32.mxu0 %vm3177_vm1, %v3178_v6 }
 0x5eb   : > { %2707 = vmatprep.subr.bf16.mxu0 %v3176_v5 }
 0x6bc   : > { %v743_v47 = vpop.f32.mrb[2].mxu0 }
 0x6bd   : > { %v747_v48 = vadd.f32 %v2462_v46, %v743_v47  ;;  %v2597_v49 = vpop.f32.mrb[3].mxu0 }
 0x6bf   : > { %2850 = vtanh.f32 %v747_v48  ;;  %v2464_v51 = vmul.f32 -1.442695, %v747_v48 }
 0x6c1   : > { %2852 = vpow2.f32 %v2464_v51 }
 0x6c9   : > { %v2851_v50 = vpop.eup %2850 }
 0x6ca   : > { %757 = vrot.lane.b32.xlu1 %v2851_v50, %s3179_s15 }
 0x6cb   : > { %v2853_v52 = vpop.eup %2852 }
 0x6cc   : > { %v751_v53 = vadd.f32 1.0, %v2853_v52 }
 0x6ce   : > { %2854 = vrcp.f32 %v751_v53 }
 0x6d8   : > { %v2855_v54 = vpop.eup %2854 }
 0x6d9   : > { %v755_v57 = vmul.f32 %v2855_v54, %v660_v41 }
 0x73c   : > { %v758_v55 = vpop.permute.xlu1 %757 }
 0x73d   : > { %v760_v56 = vmul.f32 %v2855_v54, %v758_v55 }
 0x73f   : > { %762 = vrot.lane.b32.xlu0 %v760_v56, %s3180_s13  ;;  %v2478_v56 = vld [vmem:[%s3402_s0 + $0xc] sm:$0x3] }
 0x7b1   : > { %v763_v58 = vpop.permute.xlu0 %762 }
 0x7b2   : > { %v765_v59 = vadd.f32 %v763_v58, %v755_v57 }
 0x7b4   : > { %2856 = vtanh.f32 %v765_v59 }
 0x7be   : > { %v2857_v60 = vpop.eup %2856 }
 0x7bf   : > { %768 = vrot.lane.b32.xlu1 %v2857_v60, %s3180_s13 }
 0x831   : > { %v769_v61 = vpop.permute.xlu1 %768 }
 0x832   : > { %v771_v62 = vmul.f32 %v2855_v54, %v769_v61 }
 0x834   : > { %773 = vrot.lane.b32.xlu0 %v771_v62, %s3181_s30 }
 0x8a6   : > { %v774_v63 = vpop.permute.xlu0 %773 }
 0x8a7   : > { %2465 = vst.msk [vmem:[%s3428_s14 + $0x4] sm:$0x3] %vm446_vm0, %v774_v63  ;;  %2603 = vmatmul.mubr.msk.f32.vlgmr.msra.gmra.mrb[2].mxu1 %vm459_vm2, %v774_v63 }
 0x8a8   : > { %2706 = vmatpush3.bf16.msra.mxu1 %v3437_v4  ;;  %2616 = vmatprep.mubr.msk.f32.mxu1 %vm3177_vm1, %v3178_v6 }
 0x8a9   : > { %2710 = vmatprep.subr.bf16.mxu1 %v3176_v5 }
 0x97a   : > { %v848_v3 = vpop.f32.mrb[2].mxu1 }
 0x97b   : > { %v852_v7 = vadd.f32 %v2466_v2, %v848_v3  ;;  %v2604_v8 = vpop.f32.mrb[3].mxu1 }
 0x97d   : > { %2858 = vtanh.f32 %v852_v7  ;;  %v2468_v10 = vmul.f32 -1.442695, %v852_v7 }
 0x97f   : > { %2860 = vpow2.f32 %v2468_v10 }
 0x987   : > { %v2859_v9 = vpop.eup %2858 }
 0x988   : > { %862 = vrot.lane.b32.xlu1 %v2859_v9, %s3179_s15 }
 0x989   : > { %v2861_v11 = vpop.eup %2860 }
 0x98a   : > { %v856_v12 = vadd.f32 1.0, %v2861_v11 }
 0x98c   : > { %2862 = vrcp.f32 %v856_v12 }
 0x996   : > { %v2863_v13 = vpop.eup %2862 }
 0x997   : > { %v860_v5 = vmul.f32 %v2863_v13, %v765_v59 }
 0x9fa   : > { %v863_v14 = vpop.permute.xlu1 %862 }
 0x9fb   : > { %v865_v15 = vmul.f32 %v2863_v13, %v863_v14 }
 0x9fd   : > { %867 = vrot.lane.b32.xlu0 %v865_v15, %s3180_s13  ;;  %v2482_v15 = vld [vmem:[%s3402_s0 + $0xe] sm:$0x3] }
 0xa6f   : > { %v868_v16 = vpop.permute.xlu0 %867 }
 0xa70   : > { %v870_v17 = vadd.f32 %v868_v16, %v860_v5 }
 0xa72   : > { %2864 = vtanh.f32 %v870_v17 }
 0xa7c   : > { %v2865_v18 = vpop.eup %2864 }
 0xa7d   : > { %873 = vrot.lane.b32.xlu1 %v2865_v18, %s3180_s13 }
 0xaef   : > { %v874_v19 = vpop.permute.xlu1 %873 }
 0xaf0   : > { %v876_v20 = vmul.f32 %v2863_v13, %v874_v19 }
 0xaf2   : > { %878 = vrot.lane.b32.xlu0 %v876_v20, %s3181_s30 }
 0xb64   : > { %v879_v21 = vpop.permute.xlu0 %878 }
 0xb65   : > { %2469 = vst.msk [vmem:[%s3428_s14 + $0x6] sm:$0x3] %vm446_vm0, %v879_v21  ;;  %2610 = vmatmul.mubr.msk.f32.vlgmr.msra.gmra.mrb[4].mxu0 %vm459_vm2, %v879_v21 }
 0xb66   : > { %2709 = vmatpush3.bf16.msra.mxu0 %v3437_v4  ;;  %2623 = vmatprep.mubr.msk.f32.mxu0 %vm3177_vm1, %v3178_v6 }
 0xc38   : > { %v953_v23 = vpop.f32.mrb[4].mxu0 }
 0xc39   : > { %v957_v24 = vadd.f32 %v2470_v22, %v953_v23  ;;  %v2611_v25 = vpop.f32.mrb[5].mxu0 }
 0xc3b   : > { %2866 = vtanh.f32 %v957_v24  ;;  %v2472_v27 = vmul.f32 -1.442695, %v957_v24 }
 0xc3d   : > { %2868 = vpow2.f32 %v2472_v27 }
 0xc45   : > { %v2867_v26 = vpop.eup %2866 }
 0xc46   : > { %967 = vrot.lane.b32.xlu1 %v2867_v26, %s3179_s15 }
 0xc47   : > { %v2869_v28 = vpop.eup %2868 }
 0xc48   : > { %v961_v29 = vadd.f32 1.0, %v2869_v28 }
 0xc4a   : > { %2870 = vrcp.f32 %v961_v29 }
 0xc54   : > { %v2871_v30 = vpop.eup %2870 }
 0xc55   : > { %v965_v33 = vmul.f32 %v2871_v30, %v870_v17 }
 0xcb8   : > { %v968_v31 = vpop.permute.xlu1 %967 }
 0xcb9   : > { %v970_v32 = vmul.f32 %v2871_v30, %v968_v31 }
 0xcbb   : > { %972 = vrot.lane.b32.xlu0 %v970_v32, %s3180_s13 }
 0xd2d   : > { %v973_v34 = vpop.permute.xlu0 %972 }
 0xd2e   : > { %v975_v35 = vadd.f32 %v973_v34, %v965_v33 }
 0xd30   : > { %2872 = vtanh.f32 %v975_v35 }
 0xd3a   : > { %v2873_v36 = vpop.eup %2872 }
 0xd3b   : > { %978 = vrot.lane.b32.xlu1 %v2873_v36, %s3180_s13 }
 0xdad   : > { %v979_v37 = vpop.permute.xlu1 %978 }
 0xdae   : > { %v981_v38 = vmul.f32 %v2871_v30, %v979_v37 }
 0xdb0   : > { %983 = vrot.lane.b32.xlu0 %v981_v38, %s3181_s30 }
 0xe22   : > { %v984_v39 = vpop.permute.xlu0 %983 }
 0xe23   : > { %2473 = vst.msk [vmem:[%s3428_s14 + $0x8] sm:$0x3] %vm446_vm0, %v984_v39  ;;  %2617 = vmatmul.mubr.msk.f32.vlgmr.msra.gmra.mrb[4].mxu1 %vm459_vm2, %v984_v39 }
 0xe24   : > { %2712 = vmatpush3.bf16.msra.mxu1 %v3437_v4  ;;  %2630 = vmatprep.mubr.msk.f32.mxu1 %vm3177_vm1, %v3178_v6 }
 0xef6   : > { %v1058_v41 = vpop.f32.mrb[4].mxu1 }
 0xef7   : > { %v1062_v42 = vadd.f32 %v2474_v40, %v1058_v41  ;;  %v2618_v43 = vpop.f32.mrb[5].mxu1 }
 0xef9   : > { %2874 = vtanh.f32 %v1062_v42  ;;  %v2476_v45 = vmul.f32 -1.442695, %v1062_v42 }
 0xefb   : > { %2876 = vpow2.f32 %v2476_v45 }
 0xf03   : > { %v2875_v44 = vpop.eup %2874 }
 0xf04   : > { %1072 = vrot.lane.b32.xlu1 %v2875_v44, %s3179_s15 }
 0xf05   : > { %v2877_v46 = vpop.eup %2876 }
 0xf06   : > { %v1066_v47 = vadd.f32 1.0, %v2877_v46 }
 0xf08   : > { %2878 = vrcp.f32 %v1066_v47 }
 0xf12   : > { %v2879_v48 = vpop.eup %2878 }
 0xf13   : > { %v1070_v6 = vmul.f32 %v2879_v48, %v975_v35 }
 0xf76   : > { %v1073_v4 = vpop.permute.xlu1 %1072 }
 0xf77   : > { %v1075_v49 = vmul.f32 %v2879_v48, %v1073_v4 }
 0xf79   : > { %1077 = vrot.lane.b32.xlu0 %v1075_v49, %s3180_s13 }
 0xfeb   : > { %v1078_v50 = vpop.permute.xlu0 %1077 }
 0xfec   : > { %v1080_v51 = vadd.f32 %v1078_v50, %v1070_v6 }
 0xfee   : > { %2880 = vtanh.f32 %v1080_v51 }
 0xff8   : > { %v2881_v52 = vpop.eup %2880 }
 0xff9   : > { %1083 = vrot.lane.b32.xlu1 %v2881_v52, %s3180_s13 }
0x106b   : > { %v1084_v53 = vpop.permute.xlu1 %1083 }
0x106c   : > { %v1086_v54 = vmul.f32 %v2879_v48, %v1084_v53 }
0x106e   : > { %1088 = vrot.lane.b32.xlu0 %v1086_v54, %s3181_s30 }
0x10e0   : > { %v1089_v55 = vpop.permute.xlu0 %1088 }
0x10e1   : > { %2477 = vst.msk [vmem:[%s3428_s14 + $0xa] sm:$0x3] %vm446_vm0, %v1089_v55  ;;  %2624 = vmatmul.mubr.msk.f32.vlgmr.msra.gmra.mrb[6].mxu0 %vm459_vm2, %v1089_v55 }
0x11b4   : > { %v1163_v57 = vpop.f32.mrb[6].mxu0 }
0x11b5   : > { %v1167_v58 = vadd.f32 %v2478_v56, %v1163_v57  ;;  %v2625_v59 = vpop.f32.mrb[7].mxu0 }
0x11b7   : > { %2882 = vtanh.f32 %v1167_v58  ;;  %v2480_v61 = vmul.f32 -1.442695, %v1167_v58 }
0x11b9   : > { %2884 = vpow2.f32 %v2480_v61 }
0x11c1   : > { %v2883_v60 = vpop.eup %2882 }
0x11c2   : > { %1177 = vrot.lane.b32.xlu1 %v2883_v60, %s3179_s15 }
0x11c3   : > { %v2885_v62 = vpop.eup %2884 }
0x11c4   : > { %v1171_v63 = vadd.f32 1.0, %v2885_v62 }
0x11c6   : > { %2886 = vrcp.f32 %v1171_v63 }
0x11d0   : > { %v2887_v2 = vpop.eup %2886 }
0x11d1   : > { %v1175_v8 = vmul.f32 %v2887_v2, %v1080_v51 }
0x1234   : > { %v1178_v3 = vpop.permute.xlu1 %1177 }
0x1235   : > { %v1180_v7 = vmul.f32 %v2887_v2, %v1178_v3 }
0x1237   : > { %1182 = vrot.lane.b32.xlu0 %v1180_v7, %s3180_s13 }
0x12a9   : > { %v1183_v9 = vpop.permute.xlu0 %1182 }
0x12aa   : > { %v1185_v10 = vadd.f32 %v1183_v9, %v1175_v8 }
0x12ac   : > { %2888 = vtanh.f32 %v1185_v10 }
0x12b6   : > { %v2889_v11 = vpop.eup %2888 }
0x12b7   : > { %1188 = vrot.lane.b32.xlu1 %v2889_v11, %s3180_s13 }
0x1329   : > { %v1189_v12 = vpop.permute.xlu1 %1188 }
0x132a   : > { %v1191_v13 = vmul.f32 %v2887_v2, %v1189_v12 }
0x132c   : > { %1193 = vrot.lane.b32.xlu0 %v1191_v13, %s3181_s30 }
0x139e   : > { %v1194_v14 = vpop.permute.xlu0 %1193 }
0x139f   : > { %2481 = vst.msk [vmem:[%s3428_s14 + $0xc] sm:$0x3] %vm446_vm0, %v1194_v14  ;;  %2631 = vmatmul.mubr.msk.f32.vlgmr.msra.gmra.mrb[6].mxu1 %vm459_vm2, %v1194_v14 }
0x1472   : > { %v1268_v5 = vpop.f32.mrb[6].mxu1 }
0x1473   : > { %v1272_v16 = vadd.f32 %v2482_v15, %v1268_v5  ;;  %v2632_v17 = vpop.f32.mrb[7].mxu1 }
0x1475   : > { %2890 = vtanh.f32 %v1272_v16  ;;  %v2484_v19 = vmul.f32 -1.442695, %v1272_v16 }
0x1477   : > { %2892 = vpow2.f32 %v2484_v19 }
0x147f   : > { %v2891_v18 = vpop.eup %2890 }
0x1480   : > { %1282 = vrot.lane.b32.xlu1 %v2891_v18, %s3179_s15 }
0x1481   : > { %v2893_v20 = vpop.eup %2892 }
0x1482   : > { %v1276_v21 = vadd.f32 1.0, %v2893_v20 }
0x1484   : > { %2894 = vrcp.f32 %v1276_v21 }
0x148e   : > { %v2895_v22 = vpop.eup %2894 }
0x148f   : > { %v1280_v25 = vmul.f32 %v2895_v22, %v1185_v10 }
0x14f2   : > { %v1283_v23 = vpop.permute.xlu1 %1282 }
0x14f3   : > { %v1285_v24 = vmul.f32 %v2895_v22, %v1283_v23 }
0x14f5   : > { %1287 = vrot.lane.b32.xlu0 %v1285_v24, %s3180_s13 }
0x1567   : > { %v1288_v26 = vpop.permute.xlu0 %1287 }
0x1568   : > { %v1290_v27 = vadd.f32 %v1288_v26, %v1280_v25 }
0x156a   : > { %2896 = vtanh.f32 %v1290_v27 }
0x1574   : > { %v2897_v28 = vpop.eup %2896 }
0x1575   : > { %1293 = vrot.lane.b32.xlu1 %v2897_v28, %s3180_s13 }
0x1579   : > { %1305 = vrot.lane.b32.xlu1 %v1290_v27, %s3182_s19 }
0x15e7   : > { %v1294_v29 = vpop.permute.xlu1 %1293 }
0x15e8   : > { %v1296_v30 = vmul.f32 %v2895_v22, %v1294_v29 }
0x15ea   : > { %1298 = vrot.lane.b32.xlu0 %v1296_v30, %s3181_s30 }
0x15eb   : > { %v1306_v31 = vpop.permute.xlu1 %1305 }
0x15ec   : > { %1308 = vst.msk [vmem:[#allocation3] sm:$0x3] %vm446_vm0, %v1306_v31 }
0x165c   : > { %v1299_v32 = vpop.permute.xlu0 %1298 }
0x165d   : > { %2485 = vst.msk [vmem:[%s3428_s14 + $0xe] sm:$0x3] %vm446_vm0, %v1299_v32  ;;  %1303 = vst.msk [vmem:[#allocation2] sm:$0x3] %vm446_vm0, %v1299_v32 }
0x165e PF: > { %p2486_p11 = scmp.ne.s32.totalorder %s3160_s24, 1 }
0x165f   : > { %v3541_v33 = vpack.c.bf16 (!%p2486_p11), %v3418_v1, %v3416_v0  ;;  %v3183_v34 = vmov (!%p2486_p11), 0.0|0.0   ;;  %vm3184_vm3 = vmmov (!%p2486_p11), 0   ;;  %v3185_v35 = vmov (!%p2486_p11), 0.0   ;;  %v2487_v0 = vld [vmem:[%s3402_s0 + $0xe] sm:$0x3] (!%p2486_p11)  ;;  %s3186_s28 = smov (!%p2486_p11), 80  }
0x1660   : > { %1312 = sbr.rel (%p2486_p11) target bundleno = 11350 (0x2c56), region = 56  ;;  %2713 = vmatprep.subr.bf16.mxu0 (!%p2486_p11), %v3183_v34  ;;  %2637 = vmatprep.mubr.msk.f32.mxu0 (!%p2486_p11), %vm3184_vm3, %v3185_v35  ;;  %vm1317_vm4 = vcmask (!%p2486_p11), 130048   ;;  %v1314_v40 = vld [vmem:[#allocation3] sm:$0x3] (!%p2486_p11)  ;;  %s3187_s18 = smov (!%p2486_p11), 16  }
0x1661   : > { %2715 = vmatpush3.bf16.msra.mxu0 (!%p2486_p11), %v3541_v33  ;;  %2716 = vmatprep.subr.bf16.mxu1 (!%p2486_p11), %v3183_v34  ;;  %s3188_s29 = smov (!%p2486_p11), 96   ;;  %v2491_v53 = vld [vmem:[%s3402_s0 + $0xc] sm:$0x3] (!%p2486_p11)  ;;  %v2495_v12 = vld [vmem:[%s3402_s0 + $0xa] sm:$0x3] (!%p2486_p11) }
0x1662   : > { %2718 = vmatpush3.bf16.msra.mxu1 (!%p2486_p11), %v3541_v33  ;;  %2644 = vmatprep.mubr.msk.f32.mxu1 (!%p2486_p11), %vm3184_vm3, %v3185_v35  ;;  %v2499_v29 = vld [vmem:[%s3402_s0 + $0x8] sm:$0x3] (!%p2486_p11) }
0x1663   : > { %2719 = vmatprep.subr.bf16.mxu0 (!%p2486_p11), %v3183_v34  ;;  %2722 = vmatprep.subr.bf16.mxu1 (!%p2486_p11), %v3183_v34 }
0x1664   : > { %v1313_v36 = vld [vmem:[#allocation2] sm:$0x3] (!%p2486_p11) }
0x1665   : > { %2638 = vmatmul.mubr.msk.f32.vlgmr.msra.gmra.mrb[0].mxu0 (!%p2486_p11), %vm1317_vm4, %v1313_v36 }
0x1666   : > { %2721 = vmatpush3.bf16.msra.mxu0 (!%p2486_p11), %v3541_v33  ;;  %2651 = vmatprep.mubr.msk.f32.mxu0 (!%p2486_p11), %vm3184_vm3, %v3185_v35 }
0x1667   : > { %2725 = vmatprep.subr.bf16.mxu0 %v3183_v34 }
0x1738   : > { %v1387_v1 = vpop.f32.mrb[0].mxu0 }
0x1739   : > { %v1391_v37 = vadd.f32 %v2487_v0, %v1387_v1  ;;  %v2639_v38 = vpop.f32.mrb[1].mxu0 }
0x173b   : > { %2898 = vtanh.f32 %v1391_v37  ;;  %v2489_v41 = vmul.f32 -1.442695, %v1391_v37 }
0x173d   : > { %2900 = vpow2.f32 %v2489_v41 }
0x1745   : > { %v2899_v39 = vpop.eup %2898 }
0x1746   : > { %1405 = vrot.lane.b32.xlu0 %v2899_v39, %s3186_s28 }
0x1747   : > { %v2901_v42 = vpop.eup %2900 }
0x1748   : > { %v1395_v43 = vadd.f32 1.0, %v2901_v42 }
0x174a   : > { %1400 = vrot.lane.b32.xlu0 %v1314_v40, %s3187_s18  ;;  %2902 = vrcp.f32 %v1395_v43 }
0x1754   : > { %v2903_v44 = vpop.eup %2902 }
0x17b8   : > { %v1406_v45 = vpop.permute.xlu0 %1405 }
0x17b9   : > { %v1408_v46 = vmul.f32 %v2903_v44, %v1406_v45 }
0x17bb   : > { %1410 = vrot.lane.b32.xlu1 %v1408_v46, %s3187_s18 }
0x17bc   : > { %v1401_v47 = vpop.permute.xlu0 %1400 }
0x17bd   : > { %v1403_v48 = vmul.f32 %v2903_v44, %v1401_v47  ;;  %v2503_v47 = vld [vmem:[%s3402_s0 + $0x6] sm:$0x3] }
0x182d   : > { %v1411_v4 = vpop.permute.xlu1 %1410 }
0x182e   : > { %v1413_v49 = vadd.f32 %v1411_v4, %v1403_v48 }
0x1830   : > { %2904 = vtanh.f32 %v1413_v49 }
0x183a   : > { %v2905_v6 = vpop.eup %2904 }
0x183b   : > { %1416 = vrot.lane.b32.xlu1 %v2905_v6, %s3187_s18 }
0x18ad   : > { %v1417_v50 = vpop.permute.xlu1 %1416 }
0x18ae   : > { %v1419_v51 = vmul.f32 %v2903_v44, %v1417_v50 }
0x18b0   : > { %1421 = vrot.lane.b32.xlu0 %v1419_v51, %s3188_s29 }
0x1922   : > { %v1422_v52 = vpop.permute.xlu0 %1421 }
0x1923   : > { %2490 = vst.msk [vmem:[%s3428_s14 + $0xe] sm:$0x3] %vm446_vm0, %v1422_v52  ;;  %2645 = vmatmul.mubr.msk.f32.vlgmr.msra.gmra.mrb[0].mxu1 %vm1317_vm4, %v1422_v52 }
0x1924   : > { %2724 = vmatpush3.bf16.msra.mxu1 %v3541_v33  ;;  %2658 = vmatprep.mubr.msk.f32.mxu1 %vm3184_vm3, %v3185_v35 }
0x1925   : > { %2728 = vmatprep.subr.bf16.mxu1 %v3183_v34 }
0x19f6   : > { %v1497_v54 = vpop.f32.mrb[0].mxu1 }
0x19f7   : > { %v1501_v55 = vadd.f32 %v2491_v53, %v1497_v54  ;;  %v2646_v56 = vpop.f32.mrb[1].mxu1 }
0x19f9   : > { %2906 = vtanh.f32 %v1501_v55  ;;  %v2493_v58 = vmul.f32 -1.442695, %v1501_v55 }
0x19fb   : > { %2908 = vpow2.f32 %v2493_v58 }
0x1a03   : > { %v2907_v57 = vpop.eup %2906 }
0x1a04   : > { %1511 = vrot.lane.b32.xlu1 %v2907_v57, %s3186_s28 }
0x1a05   : > { %v2909_v59 = vpop.eup %2908 }
0x1a06   : > { %v1505_v60 = vadd.f32 1.0, %v2909_v59 }
0x1a08   : > { %2910 = vrcp.f32 %v1505_v60 }
0x1a12   : > { %v2911_v61 = vpop.eup %2910 }
0x1a13   : > { %v1509_v2 = vmul.f32 %v2911_v61, %v1413_v49 }
0x1a76   : > { %v1512_v62 = vpop.permute.xlu1 %1511 }
0x1a77   : > { %v1514_v63 = vmul.f32 %v2911_v61, %v1512_v62 }
0x1a79   : > { %1516 = vrot.lane.b32.xlu0 %v1514_v63, %s3187_s18  ;;  %v2507_v63 = vld [vmem:[%s3402_s0 + $0x4] sm:$0x3] }
0x1aeb   : > { %v1517_v3 = vpop.permute.xlu0 %1516 }
0x1aec   : > { %v1519_v7 = vadd.f32 %v1517_v3, %v1509_v2 }
0x1aee   : > { %2912 = vtanh.f32 %v1519_v7 }
0x1af8   : > { %v2913_v8 = vpop.eup %2912 }
0x1af9   : > { %1522 = vrot.lane.b32.xlu1 %v2913_v8, %s3187_s18 }
0x1b6b   : > { %v1523_v9 = vpop.permute.xlu1 %1522 }
0x1b6c   : > { %v1525_v10 = vmul.f32 %v2911_v61, %v1523_v9 }
0x1b6e   : > { %1527 = vrot.lane.b32.xlu0 %v1525_v10, %s3188_s29 }
0x1be0   : > { %v1528_v11 = vpop.permute.xlu0 %1527 }
0x1be1   : > { %2494 = vst.msk [vmem:[%s3428_s14 + $0xc] sm:$0x3] %vm446_vm0, %v1528_v11  ;;  %2652 = vmatmul.mubr.msk.f32.vlgmr.msra.gmra.mrb[2].mxu0 %vm1317_vm4, %v1528_v11 }
0x1be2   : > { %2727 = vmatpush3.bf16.msra.mxu0 %v3541_v33  ;;  %2665 = vmatprep.mubr.msk.f32.mxu0 %vm3184_vm3, %v3185_v35 }
0x1be3   : > { %2731 = vmatprep.subr.bf16.mxu0 %v3183_v34 }
0x1cb4   : > { %v1602_v13 = vpop.f32.mrb[2].mxu0 }
0x1cb5   : > { %v1606_v14 = vadd.f32 %v2495_v12, %v1602_v13  ;;  %v2653_v15 = vpop.f32.mrb[3].mxu0 }
0x1cb7   : > { %2914 = vtanh.f32 %v1606_v14  ;;  %v2497_v16 = vmul.f32 -1.442695, %v1606_v14 }
0x1cb9   : > { %2916 = vpow2.f32 %v2497_v16 }
0x1cc1   : > { %v2915_v5 = vpop.eup %2914 }
0x1cc2   : > { %1616 = vrot.lane.b32.xlu1 %v2915_v5, %s3186_s28 }
0x1cc3   : > { %v2917_v17 = vpop.eup %2916 }
0x1cc4   : > { %v1610_v18 = vadd.f32 1.0, %v2917_v17 }
0x1cc6   : > { %2918 = vrcp.f32 %v1610_v18 }
0x1cd0   : > { %v2919_v19 = vpop.eup %2918 }
0x1cd1   : > { %v1614_v22 = vmul.f32 %v2919_v19, %v1519_v7 }
0x1d34   : > { %v1617_v20 = vpop.permute.xlu1 %1616 }
0x1d35   : > { %v1619_v21 = vmul.f32 %v2919_v19, %v1617_v20 }
0x1d37   : > { %1621 = vrot.lane.b32.xlu0 %v1619_v21, %s3187_s18 }
0x1da9   : > { %v1622_v23 = vpop.permute.xlu0 %1621 }
0x1daa   : > { %v1624_v24 = vadd.f32 %v1622_v23, %v1614_v22 }
0x1dac   : > { %2920 = vtanh.f32 %v1624_v24 }
0x1db6   : > { %v2921_v25 = vpop.eup %2920 }
0x1db7   : > { %1627 = vrot.lane.b32.xlu1 %v2921_v25, %s3187_s18 }
0x1e29   : > { %v1628_v26 = vpop.permute.xlu1 %1627 }
0x1e2a   : > { %v1630_v27 = vmul.f32 %v2919_v19, %v1628_v26  ;;  %v2511_v19 = vld [vmem:[%s3402_s0 + $0x2] sm:$0x3] }
0x1e2c   : > { %1632 = vrot.lane.b32.xlu0 %v1630_v27, %s3188_s29 }
0x1e9e   : > { %v1633_v28 = vpop.permute.xlu0 %1632 }
0x1e9f   : > { %2498 = vst.msk [vmem:[%s3428_s14 + $0xa] sm:$0x3] %vm446_vm0, %v1633_v28  ;;  %2659 = vmatmul.mubr.msk.f32.vlgmr.msra.gmra.mrb[2].mxu1 %vm1317_vm4, %v1633_v28 }
0x1ea0   : > { %2730 = vmatpush3.bf16.msra.mxu1 %v3541_v33  ;;  %2672 = vmatprep.mubr.msk.f32.mxu1 %vm3184_vm3, %v3185_v35 }
0x1ea1   : > { %2734 = vmatprep.subr.bf16.mxu1 %v3183_v34 }
0x1f72   : > { %v1707_v30 = vpop.f32.mrb[2].mxu1 }
0x1f73   : > { %v1711_v31 = vadd.f32 %v2499_v29, %v1707_v30  ;;  %v2660_v32 = vpop.f32.mrb[3].mxu1 }
0x1f75   : > { %2922 = vtanh.f32 %v1711_v31  ;;  %v2501_v0 = vmul.f32 -1.442695, %v1711_v31 }
0x1f77   : > { %2924 = vpow2.f32 %v2501_v0 }
0x1f7f   : > { %v2923_v36 = vpop.eup %2922 }
0x1f80   : > { %1721 = vrot.lane.b32.xlu1 %v2923_v36, %s3186_s28 }
0x1f81   : > { %v2925_v1 = vpop.eup %2924 }
0x1f82   : > { %v1715_v37 = vadd.f32 1.0, %v2925_v1 }
0x1f84   : > { %2926 = vrcp.f32 %v1715_v37 }
0x1f8e   : > { %v2927_v38 = vpop.eup %2926 }
0x1f8f   : > { %v1719_v34 = vmul.f32 %v2927_v38, %v1624_v24 }
0x1ff2   : > { %v1722_v39 = vpop.permute.xlu1 %1721 }
0x1ff3   : > { %v1724_v40 = vmul.f32 %v2927_v38, %v1722_v39 }
0x1ff5   : > { %1726 = vrot.lane.b32.xlu0 %v1724_v40, %s3187_s18 }
0x2067   : > { %v1727_v41 = vpop.permute.xlu0 %1726 }
0x2068   : > { %v1729_v42 = vadd.f32 %v1727_v41, %v1719_v34 }
0x206a   : > { %2928 = vtanh.f32 %v1729_v42 }
0x2074   : > { %v2929_v43 = vpop.eup %2928 }
0x2075   : > { %1732 = vrot.lane.b32.xlu1 %v2929_v43, %s3187_s18 }
0x20e7   : > { %v1733_v44 = vpop.permute.xlu1 %1732 }
0x20e8   : > { %v1735_v45 = vmul.f32 %v2927_v38, %v1733_v44  ;;  %v2057_v38 = vld [vmem:[%s3402_s0] sm:$0x3]  ;;  %s3189_s0 = smov 112  }
0x20ea   : > { %1737 = vrot.lane.b32.xlu0 %v1735_v45, %s3188_s29 }
0x215c   : > { %v1738_v46 = vpop.permute.xlu0 %1737 }
0x215d   : > { %2502 = vst.msk [vmem:[%s3428_s14 + $0x8] sm:$0x3] %vm446_vm0, %v1738_v46  ;;  %2666 = vmatmul.mubr.msk.f32.vlgmr.msra.gmra.mrb[4].mxu0 %vm1317_vm4, %v1738_v46 }
0x215e   : > { %2733 = vmatpush3.bf16.msra.mxu0 %v3541_v33  ;;  %2679 = vmatprep.mubr.msk.f32.mxu0 %vm3184_vm3, %v3185_v35 }
0x2230   : > { %v1812_v48 = vpop.f32.mrb[4].mxu0 }
0x2231   : > { %v1816_v4 = vadd.f32 %v2503_v47, %v1812_v48  ;;  %v2667_v49 = vpop.f32.mrb[5].mxu0 }
0x2233   : > { %2930 = vtanh.f32 %v1816_v4  ;;  %v2505_v50 = vmul.f32 -1.442695, %v1816_v4 }
0x2235   : > { %2932 = vpow2.f32 %v2505_v50 }
0x223d   : > { %v2931_v6 = vpop.eup %2930 }
0x223e   : > { %1826 = vrot.lane.b32.xlu1 %v2931_v6, %s3186_s28 }
0x223f   : > { %v2933_v51 = vpop.eup %2932 }
0x2240   : > { %v1820_v52 = vadd.f32 1.0, %v2933_v51 }
0x2242   : > { %2934 = vrcp.f32 %v1820_v52 }
0x224c   : > { %v2935_v53 = vpop.eup %2934 }
0x224d   : > { %v1824_v56 = vmul.f32 %v2935_v53, %v1729_v42 }
0x22b0   : > { %v1827_v54 = vpop.permute.xlu1 %1826 }
0x22b1   : > { %v1829_v55 = vmul.f32 %v2935_v53, %v1827_v54 }
0x22b3   : > { %1831 = vrot.lane.b32.xlu0 %v1829_v55, %s3187_s18 }
0x2325   : > { %v1832_v57 = vpop.permute.xlu0 %1831 }
0x2326   : > { %v1834_v58 = vadd.f32 %v1832_v57, %v1824_v56 }
0x2328   : > { %2936 = vtanh.f32 %v1834_v58 }
0x2332   : > { %v2937_v59 = vpop.eup %2936 }
0x2333   : > { %1837 = vrot.lane.b32.xlu1 %v2937_v59, %s3187_s18 }
0x23a5   : > { %v1838_v60 = vpop.permute.xlu1 %1837 }
0x23a6   : > { %v1840_v61 = vmul.f32 %v2935_v53, %v1838_v60 }
0x23a8   : > { %1842 = vrot.lane.b32.xlu0 %v1840_v61, %s3188_s29 }
0x241a   : > { %v1843_v62 = vpop.permute.xlu0 %1842 }
0x241b   : > { %2506 = vst.msk [vmem:[%s3428_s14 + $0x6] sm:$0x3] %vm446_vm0, %v1843_v62  ;;  %2673 = vmatmul.mubr.msk.f32.vlgmr.msra.gmra.mrb[4].mxu1 %vm1317_vm4, %v1843_v62 }
0x241c   : > { %2736 = vmatpush3.bf16.msra.mxu1 %v3541_v33  ;;  %2686 = vmatprep.mubr.msk.f32.mxu1 %vm3184_vm3, %v3185_v35 }
0x24ee   : > { %v1917_v2 = vpop.f32.mrb[4].mxu1 }
0x24ef   : > { %v1921_v3 = vadd.f32 %v2507_v63, %v1917_v2  ;;  %v2674_v7 = vpop.f32.mrb[5].mxu1 }
0x24f1   : > { %2938 = vtanh.f32 %v1921_v3  ;;  %v2509_v9 = vmul.f32 -1.442695, %v1921_v3 }
0x24f3   : > { %2940 = vpow2.f32 %v2509_v9 }
0x24fb   : > { %v2939_v8 = vpop.eup %2938 }
0x24fc   : > { %1931 = vrot.lane.b32.xlu1 %v2939_v8, %s3186_s28 }
0x24fd   : > { %v2941_v10 = vpop.eup %2940 }
0x24fe   : > { %v1925_v11 = vadd.f32 1.0, %v2941_v10 }
0x2500   : > { %2942 = vrcp.f32 %v1925_v11 }
0x250a   : > { %v2943_v12 = vpop.eup %2942 }
0x250b   : > { %v1929_v35 = vmul.f32 %v2943_v12, %v1834_v58 }
0x256e   : > { %v1932_v33 = vpop.permute.xlu1 %1931 }
0x256f   : > { %v1934_v13 = vmul.f32 %v2943_v12, %v1932_v33 }
0x2571   : > { %1936 = vrot.lane.b32.xlu0 %v1934_v13, %s3187_s18 }
0x25e3   : > { %v1937_v14 = vpop.permute.xlu0 %1936 }
0x25e4   : > { %v1939_v15 = vadd.f32 %v1937_v14, %v1929_v35 }
0x25e6   : > { %2944 = vtanh.f32 %v1939_v15 }
0x25f0   : > { %v2945_v5 = vpop.eup %2944 }
0x25f1   : > { %1942 = vrot.lane.b32.xlu1 %v2945_v5, %s3187_s18 }
0x2663   : > { %v1943_v16 = vpop.permute.xlu1 %1942 }
0x2664   : > { %v1945_v17 = vmul.f32 %v2943_v12, %v1943_v16 }
0x2666   : > { %1947 = vrot.lane.b32.xlu0 %v1945_v17, %s3188_s29 }
0x26d8   : > { %v1948_v18 = vpop.permute.xlu0 %1947 }
0x26d9   : > { %2510 = vst.msk [vmem:[%s3428_s14 + $0x4] sm:$0x3] %vm446_vm0, %v1948_v18  ;;  %2680 = vmatmul.mubr.msk.f32.vlgmr.msra.gmra.mrb[6].mxu0 %vm1317_vm4, %v1948_v18 }
0x27ac   : > { %v2022_v20 = vpop.f32.mrb[6].mxu0 }
0x27ad   : > { %v2026_v21 = vadd.f32 %v2511_v19, %v2022_v20  ;;  %v2681_v22 = vpop.f32.mrb[7].mxu0 }
0x27af   : > { %2946 = vtanh.f32 %v2026_v21  ;;  %v2513_v24 = vmul.f32 -1.442695, %v2026_v21 }
0x27b1   : > { %2948 = vpow2.f32 %v2513_v24 }
0x27b9   : > { %v2947_v23 = vpop.eup %2946 }
0x27ba   : > { %2036 = vrot.lane.b32.xlu1 %v2947_v23, %s3186_s28 }
0x27bb   : > { %v2949_v25 = vpop.eup %2948 }
0x27bc   : > { %v2030_v26 = vadd.f32 1.0, %v2949_v25 }
0x27be   : > { %2950 = vrcp.f32 %v2030_v26 }
0x27c8   : > { %v2951_v27 = vpop.eup %2950 }
0x27c9   : > { %v2034_v30 = vmul.f32 %v2951_v27, %v1939_v15 }
0x282c   : > { %v2037_v28 = vpop.permute.xlu1 %2036 }
0x282d   : > { %v2039_v29 = vmul.f32 %v2951_v27, %v2037_v28 }
0x282f   : > { %2041 = vrot.lane.b32.xlu0 %v2039_v29, %s3187_s18 }
0x28a1   : > { %v2042_v31 = vpop.permute.xlu0 %2041 }
0x28a2   : > { %v2044_v32 = vadd.f32 %v2042_v31, %v2034_v30 }
0x28a4   : > { %2952 = vtanh.f32 %v2044_v32 }
0x28ae   : > { %v2953_v36 = vpop.eup %2952 }
0x28af   : > { %2047 = vrot.lane.b32.xlu1 %v2953_v36, %s3187_s18 }
0x2921   : > { %v2048_v0 = vpop.permute.xlu1 %2047 }
0x2922   : > { %v2050_v1 = vmul.f32 %v2951_v27, %v2048_v0 }
0x2924   : > { %2052 = vrot.lane.b32.xlu0 %v2050_v1, %s3188_s29 }
0x2996   : > { %v2053_v37 = vpop.permute.xlu0 %2052 }
0x2997   : > { %2514 = vst.msk [vmem:[%s3428_s14 + $0x2] sm:$0x3] %vm446_vm0, %v2053_v37  ;;  %2687 = vmatmul.mubr.msk.f32.vlgmr.msra.gmra.mrb[6].mxu1 %vm1317_vm4, %v2053_v37 }
0x2a6a   : > { %v2126_v39 = vpop.f32.mrb[6].mxu1 }
0x2a6b   : > { %v2130_v40 = vadd.f32 %v2126_v39, %v2057_v38  ;;  %v2688_v34 = vpop.f32.mrb[7].mxu1 }
0x2a6d   : > { %2954 = vtanh.f32 %v2130_v40  ;;  %v2516_v42 = vmul.f32 -1.442695, %v2130_v40 }
0x2a6f   : > { %2956 = vpow2.f32 %v2516_v42 }
0x2a77   : > { %v2955_v41 = vpop.eup %2954 }
0x2a78   : > { %2140 = vrot.lane.b32.xlu1 %v2955_v41, %s3186_s28 }
0x2a79   : > { %v2957_v43 = vpop.eup %2956 }
0x2a7a   : > { %v2134_v44 = vadd.f32 1.0, %v2957_v43 }
0x2a7c   : > { %2958 = vrcp.f32 %v2134_v44 }
0x2a86   : > { %v2959_v45 = vpop.eup %2958 }
0x2a87   : > { %v2138_v48 = vmul.f32 %v2959_v45, %v2044_v32 }
0x2aea   : > { %v2141_v46 = vpop.permute.xlu1 %2140 }
0x2aeb   : > { %v2143_v47 = vmul.f32 %v2959_v45, %v2141_v46 }
0x2aed   : > { %2145 = vrot.lane.b32.xlu0 %v2143_v47, %s3187_s18 }
0x2b5f   : > { %v2146_v4 = vpop.permute.xlu0 %2145 }
0x2b60   : > { %v2148_v49 = vadd.f32 %v2146_v4, %v2138_v48 }
0x2b62   : > { %2960 = vtanh.f32 %v2148_v49 }
0x2b6c   : > { %v2961_v6 = vpop.eup %2960 }
0x2b6d   : > { %2151 = vrot.lane.b32.xlu1 %v2961_v6, %s3187_s18 }
0x2b71   : > { %2162 = vrot.lane.b32.xlu1 %v2148_v49, %s3189_s0 }
0x2bdf   : > { %v2152_v50 = vpop.permute.xlu1 %2151 }
0x2be0   : > { %v2154_v51 = vmul.f32 %v2959_v45, %v2152_v50 }
0x2be2   : > { %2156 = vrot.lane.b32.xlu0 %v2154_v51, %s3188_s29 }
0x2be3   : > { %v2163_v52 = vpop.permute.xlu1 %2162 }
0x2be4   : > { %2165 = vst.msk [vmem:[#allocation3] sm:$0x3] %vm446_vm0, %v2163_v52 }
0x2c54   : > { %v2157_v53 = vpop.permute.xlu0 %2156 }
0x2c55   : > { %2159 = vst.msk [vmem:[%s3428_s14] sm:$0x3] %vm446_vm0, %v2157_v53  ;;  %2160 = vst.msk [vmem:[#allocation2] sm:$0x3] %vm446_vm0, %v2157_v53 }
0x2c56 PF: > { %v2169_v55 = vld [vmem:[#allocation3] sm:$0x3]  ;;  %s2176_s17 = sand.u32 1, %s3261_s27   ;;  %s2522_s8 = sshll.u32 %s3160_s24, 5 }
0x2c57   : > { %2170 = vst.msk [vmem:[%s3432_s11] sm:$0x3] %vm446_vm0, %v2169_v55  ;;  %s3651_s15 = scalar_lea.hbm %s3761_s5, %s2522_s8  ;;  %s2218_s13 = sshll.u32 %s3430_s7, 4  ;;  %s2219_s13 = int_to_ptr.vmem [resolvable:$true] %s2218_s13 }
0x2c58   : > { %s3657_s28 = scalar_lea.hbm %s3762_s6, %s2522_s8  ;;  %s3659_s18 = scalar_lea.sflag [#allocation11], %s2176_s17 }
0x2c59   : > { %s3022_s27 = scalar_lea.vmem %s2219_s13, 32  ;;  %p3783_p7 = scmp.ne.s32.totalorder %s3773_s10, 0 }
0x2c5a   : > { %p3023_p13 = scmp.ne.s32.totalorder %s2219_s13, %s3022_s27  ;;  %s3190_s29 = smov [#allocation10]  }
0x2c5b   : > { %s3026_s0 = sshll.u32 %s3190_s29, 4  ;;  %s3027_s0 = int_to_ptr.vmem [resolvable:$false] %s3026_s0 }
0x2c5c   : > { %v2166_v54 = vld [vmem:[#allocation2] sm:$0x3]  ;;  %p3024_p10 = pnand %p3023_p13, %p3783_p7  ;;  %s3028_s20 = scalar_lea.vmem %s3027_s0, 64 }
0x2c5d   : > { %2168 = vst.msk [vmem:[%s3430_s7] sm:$0x3] %vm446_vm0, %v2166_v54  ;;  %p3029_p9 = scmp.lt.s32.totalorder %s2219_s13, %s3027_s0  ;;  %p3030_p1 = scmp.lt.s32.totalorder %s3028_s20, %s3022_s27 }
0x2c5e   : > { %p3025_p12 = pneg %p3024_p10 }
0x2c5f   : > { %p3031_p6 = por %p3030_p1, %p3029_p9 }
0x2c61   : > { %p3032_p2 = pnand %p3031_p6, %p3025_p12 }
0x2c63   : > { %3035 = shalt.err (!%p3032_p2)
}
0x2c64   : > { %s3036_s7 = scalar_lea.hbm %s3651_s15, 32  ;;  %s3040_s9 = scalar_lea.hbm %s3761_s5, 64 }
0x2c65   : > { %p3037_p5 = scmp.ne.s32.totalorder %s3651_s15, %s3036_s7  ;;  %p3041_p0 = scmp.lt.u32.totalorder %s3651_s15, %s3761_s5 }
0x2c66   : > { %p3042_p3 = scmp.lt.u32.totalorder %s3040_s9, %s3036_s7  ;;  %p3044_p13 = scmp.lt.u32.totalorder %s3036_s7, %s3651_s15 }
0x2c67   : > { %p3038_p4 = pnand %p3037_p5, %p3783_p7 }
0x2c68   : > { %p3043_p11 = por %p3042_p3, %p3041_p0 }
0x2c69   : > { %p3039_p8 = pneg %p3038_p4 }
0x2c6a   : > { %p3045_p10 = por %p3044_p13, %p3043_p11 }
0x2c6c   : > { %p3046_p12 = pnand %p3045_p10, %p3039_p8 }
0x2c6e   : > { %3049 = shalt.err (!%p3046_p12)
}
0x2c6f   : > { %2742 = dma.vmem_to_hbm [thread:$0]  (%p3783_p7), %s2219_s13, 32, %s3651_s15, %s3659_s18  }
0x2c70   : > { %s2528_s27 = sshll.u32 %s3160_s24, 8  ;;  %s2201_s29 = sshll.u32 %s3428_s14, 4  ;;  %s3686_s29 = int_to_ptr.vmem [resolvable:$true] %s2201_s29 }
0x2c71   : > { %s3684_s17 = scalar_lea.hbm %s3760_s4, %s2528_s27  ;;  %s2172_s7 = scalar_lea.sflag [#allocation6], %s3398_s16 }
0x2c72   : > { %s3050_s8 = scalar_lea.vmem %s3686_s29, 256  ;;  %s3191_s9 = smov [#allocation9]  }
0x2c73   : > { %p3051_p9 = scmp.ne.s32.totalorder %s3686_s29, %s3050_s8  ;;  %s3054_s15 = sshll.u32 %s3191_s9, 4  ;;  %s3055_s15 = int_to_ptr.vmem [resolvable:$false] %s3054_s15 }
0x2c74   : > { %s3056_s24 = scalar_lea.vmem %s3055_s15, 512  ;;  %p3057_p2 = scmp.lt.s32.totalorder %s3686_s29, %s3055_s15 }
0x2c75   : > { %p3052_p1 = pnand %p3051_p9, %p3783_p7  ;;  %p3058_p5 = scmp.lt.s32.totalorder %s3056_s24, %s3050_s8 }
0x2c77   : > { %p3053_p6 = pneg %p3052_p1  ;;  %p3059_p4 = por %p3058_p5, %p3057_p2 }
0x2c79   : > { %p3060_p8 = pnand %p3059_p4, %p3053_p6 }
0x2c7b   : > { %3063 = shalt.err (!%p3060_p8)
}
0x2c7c   : > { %s3064_s14 = scalar_lea.hbm %s3684_s17, 256  ;;  %s3068_s19 = scalar_lea.hbm %s3760_s4, 512 }
0x2c7d   : > { %p3065_p0 = scmp.ne.s32.totalorder %s3684_s17, %s3064_s14  ;;  %p3069_p13 = scmp.lt.u32.totalorder %s3684_s17, %s3760_s4 }
0x2c7e   : > { %p3070_p10 = scmp.lt.u32.totalorder %s3068_s19, %s3064_s14  ;;  %p3072_p9 = scmp.lt.u32.totalorder %s3064_s14, %s3684_s17 }
0x2c7f   : > { %p3066_p3 = pnand %p3065_p0, %p3783_p7 }
0x2c80   : > { %p3071_p12 = por %p3070_p10, %p3069_p13 }
0x2c81   : > { %p3067_p11 = pneg %p3066_p3 }
0x2c82   : > { %p3073_p1 = por %p3072_p9, %p3071_p12 }
0x2c84   : > { %p3074_p6 = pnand %p3073_p1, %p3067_p11 }
0x2c86   : > { %3077 = shalt.err (!%p3074_p6)
}
0x2c87   : > { %s3192_s20 = smov 32   ;;  %s3193_s8 = smov 2  }
0x2c88   : > { %2741 = dma.vmem_to_hbm [thread:$0]  (%p3783_p7), %s3686_s29, 256, %s3684_s17, %s2172_s7, %s3192_s20, %s3192_s20, %s3193_s8  }
0x2c89   : > { %s2232_s9 = sshll.u32 %s3432_s11, 4  ;;  %s3194_s24 = smov [#allocation12]   ;;  %s2233_s9 = int_to_ptr.vmem [resolvable:$true] %s2232_s9 }
0x2c8a   : > { %s3078_s15 = scalar_lea.vmem %s2233_s9, 32  ;;  %s3082_s14 = sshll.u32 %s3194_s24, 4  ;;  %s3083_s14 = int_to_ptr.vmem [resolvable:$false] %s3082_s14 }
0x2c8b   : > { %p3079_p2 = scmp.ne.s32.totalorder %s2233_s9, %s3078_s15  ;;  %s3084_s13 = scalar_lea.vmem %s3083_s14, 64 }
0x2c8c   : > { %p3085_p8 = scmp.lt.s32.totalorder %s2233_s9, %s3083_s14  ;;  %p3086_p0 = scmp.lt.s32.totalorder %s3084_s13, %s3078_s15 }
0x2c8d   : > { %p3080_p5 = pnand %p3079_p2, %p3783_p7 }
0x2c8e   : > { %p3087_p3 = por %p3086_p0, %p3085_p8 }
0x2c8f   : > { %p3081_p4 = pneg %p3080_p5 }
0x2c91   : > { %p3088_p11 = pnand %p3087_p3, %p3081_p4 }
0x2c93   : > { %3091 = shalt.err (!%p3088_p11)
}
0x2c94   : > { %s3092_s16 = scalar_lea.hbm %s3657_s28, 32  ;;  %s3096_s17 = scalar_lea.hbm %s3762_s6, 64 }
0x2c95   : > { %p3093_p13 = scmp.ne.s32.totalorder %s3657_s28, %s3092_s16  ;;  %p3097_p9 = scmp.lt.u32.totalorder %s3657_s28, %s3762_s6 }
0x2c96   : > { %p3098_p1 = scmp.lt.u32.totalorder %s3096_s17, %s3092_s16  ;;  %p3100_p2 = scmp.lt.u32.totalorder %s3092_s16, %s3657_s28 }
0x2c97   : > { %p3094_p10 = pnand %p3093_p13, %p3783_p7 }
0x2c98   : > { %p3099_p6 = por %p3098_p1, %p3097_p9 }
0x2c99   : > { %p3095_p12 = pneg %p3094_p10 }
0x2c9a   : > { %p3101_p5 = por %p3100_p2, %p3099_p6 }
0x2c9c   : > { %p3102_p4 = pnand %p3101_p5, %p3095_p12 }
0x2c9e   : > { %3105 = shalt.err (!%p3102_p4)
}
0x2c9f   : > { %2743 = dma.vmem_to_hbm [thread:$0]  (%p3783_p7), %s2233_s9, 32, %s3657_s28, %s3659_s18  }
0x2ca0 PF: > { %s2244_s19 = sand.u32 1, %s3148_s21   ;;  %p3784_p8 = scmp.ne.s32.totalorder %s3775_s12, 0 }
0x2ca1   : > { %p3785_p0 = scmp.ge.s32.totalorder %s3168_s26, 2  ;;  %s2245_s27 = scalar_lea.sflag [#allocation6], %s2244_s19 }
0x2ca3   : > { %p2755_p3 = pnand %p3785_p0, %p3784_p8 }
0x2ca5   : > { %3139 = dma.done.wait (!%p2755_p3), %s2245_s27, 256  }
0x2ca6   : > { %3141 = vsyncadd (!%p2755_p3), %s2245_s27, 4294967040  ;;  %s3786_s0 = sadd.s32 4294967294, %s3168_s26  }
0x2ca7   : > { %s2253_s20 = sand.u32 1, %s3786_s0  }
0x2ca8   : > { %s2254_s8 = scalar_lea.sflag [#allocation11], %s2253_s20 }
0x2ca9   : > { %3143 = dma.done.wait (!%p2755_p3), %s2254_s8, 64  }
0x2caa   : > { %3145 = vsyncadd (!%p2755_p3), %s2254_s8, 4294967232  ;;  %s29_s26 = sadd.s32 1, %s3168_s26   ;;  %s3787_s10 = sld [smem:[#allocation18_spill]] }
0x2cab   : > { %p26_p7 = scmp.ge.s32.totalorder %s29_s26, 4   ;;  %s3788_s28 = sld [smem:[#allocation17_spill]] }
0x2cac   : > { %s3789_s21 = smov %s3152_s22  ;;  %s3790_s22 = smov %s3156_s23 }
0x2cad   : > { %s3792_s24 = smov %s3164_s25  ;;  %28 = sbr.rel (!%p26_p7) target bundleno = 12 (0xc), region = 172 }
0x2cb0   : > { %s3791_s23 = smov %s3787_s10 }
0x2cb1   : > { %s3793_s25 = smov %s3788_s28 }
0x2cb4   :  { %2268 = vsyncpa [#allocation5], 1 }
0x2cb5   :  { %2270 = vsyncpa [#allocation5 + $0x1], 1 }
0x2cb6   :  { %2271 = vsyncpa [#allocation8], 1 }
0x2cb7   :  { %2273 = vsyncpa [#allocation8 + $0x1], 1 }
0x2cb8   :  { %2274 = vsyncpa [#allocation6], 1 }
0x2cb9   :  { %2276 = vsyncpa [#allocation6 + $0x1], 1 }
0x2cba   :  { %2277 = vsyncpa [#allocation11], 1 }
0x2cbb   :  { %2279 = vsyncpa [#allocation11 + $0x1], 1 }

</bundles_post_ra>
